<compile_context>
chip_gen: v7x
topology: tpu7x:2x2x1
jax: 0.10.0
libtpu: 0.0.40
codegen_flags: <defaults>
</compile_context>

<pallas_src>
import functools
import math

import jax
import jax.numpy as jnp
from jax.experimental import pallas as pl
from jax.experimental.pallas import tpu as pltpu


# -------------------- in-kernel math helpers (all f32) --------------------

def _layernorm_f32(x, g, b, eps=1e-5):
    mu = jnp.mean(x, axis=-1, keepdims=True)
    var = jnp.mean((x - mu) ** 2, axis=-1, keepdims=True)
    return (x - mu) * jax.lax.rsqrt(var + eps) * g + b


def _erf_f32(x):
    # Abramowitz & Stegun 7.1.26 polynomial erf (|abs err| <= 1.5e-7): keeps
    # torch.nn.GELU() exact-erf semantics well below bf16 matmul noise while
    # only using exp / mul / add / where (guaranteed Mosaic lowerings).
    a1, a2, a3, a4, a5 = (0.254829592, -0.284496736, 1.421413741,
                          -1.453152027, 1.061405429)
    p = 0.3275911
    sgn = jnp.where(x >= 0.0, 1.0, -1.0)
    ax = jnp.abs(x)
    t = 1.0 / (1.0 + p * ax)
    poly = ((((a5 * t + a4) * t + a3) * t + a2) * t + a1) * t
    return sgn * (1.0 - poly * jnp.exp(-ax * ax))


def _gelu_exact(x):
    return 0.5 * x * (1.0 + _erf_f32(x * 0.7071067811865476))


# -------------------- fused transformer-stack kernel --------------------

def _gpt2_stack_kernel(x_ref,
                       ln1g_ref, ln1b_ref, wqkv_ref, bqkv_ref,
                       wpo_ref, bpo_ref,
                       ln2g_ref, ln2b_ref, wfc_ref, bfc_ref,
                       wpm_ref, bpm_ref,
                       o_ref, res_ref, *, n_head):
    """One (batch_block, layer) grid step: attn sub-layer + MLP sub-layer."""
    layer = pl.program_id(1)

    @pl.when(layer == 0)
    def _init():
        res_ref[...] = x_ref[...].astype(jnp.float32)

    x3 = res_ref[...]                                # (BB, T, C) f32 residual
    BB, T, C = x3.shape
    hs = C // n_head
    x2 = x3.reshape(BB * T, C)                       # all B*T rows per MXU pass

    # ---------------- attention sub-layer ----------------
    h = _layernorm_f32(x2, ln1g_ref[0], ln1b_ref[0])
    # 1/sqrt(hs) already folded into the Q columns of W_qkv / b_qkv.
    qkv = jnp.dot(h.astype(jnp.bfloat16), wqkv_ref[0],
                  preferred_element_type=jnp.float32) + bqkv_ref[0]   # (BB*T, 3C)

    row = jax.lax.broadcasted_iota(jnp.int32, (T, T), 0)
    col = jax.lax.broadcasted_iota(jnp.int32, (T, T), 1)
    causal = (col <= row)[None]                                        # (1, T, T)

    wpo = wpo_ref[0]                                                   # (C, C) bf16
    attn_out = jnp.zeros((BB * T, C), jnp.float32)
    for hd in range(n_head):       # static unroll; each head batched over BB
        lo = hd * hs
        qh = qkv[:, lo:lo + hs].reshape(BB, T, hs).astype(jnp.bfloat16)
        kh = qkv[:, C + lo:C + lo + hs].reshape(BB, T, hs).astype(jnp.bfloat16)
        vh = qkv[:, 2 * C + lo:2 * C + lo + hs].reshape(BB, T, hs).astype(jnp.bfloat16)

        s = jnp.einsum('bqd,bkd->bqk', qh, kh,
                       preferred_element_type=jnp.float32)             # (BB, T, T)
        s = jnp.where(causal, s, -1e30)                # finite fill (no NaN risk)
        s = s - jnp.max(s, axis=-1, keepdims=True)
        p = jnp.exp(s)
        # approx reciprocal (EUP slot); ~2^-12 rel err, fine for inference.
        p = p * pl.reciprocal(jnp.sum(p, axis=-1, keepdims=True), approx=True)

        yh = jnp.einsum('bqk,bkd->bqd', p.astype(jnp.bfloat16), vh,
                        preferred_element_type=jnp.float32)            # (BB, T, hs)
        # Contract this head straight into its W_proj rows: never repack (T, C).
        attn_out = attn_out + jnp.dot(
            yh.reshape(BB * T, hs).astype(jnp.bfloat16), wpo[lo:lo + hs, :],
            preferred_element_type=jnp.float32)

    x2 = x2 + attn_out + bpo_ref[0]                  # residual + proj bias

    # ---------------- MLP sub-layer ----------------
    h2 = _layernorm_f32(x2, ln2g_ref[0], ln2b_ref[0])
    f = jnp.dot(h2.astype(jnp.bfloat16), wfc_ref[0],
                preferred_element_type=jnp.float32) + bfc_ref[0]
    f = _gelu_exact(f)
    m = jnp.dot(f.astype(jnp.bfloat16), wpm_ref[0],
                preferred_element_type=jnp.float32) + bpm_ref[0]
    x2 = x2 + m                                      # residual

    out3 = x2.reshape(BB, T, C)
    res_ref[...] = out3                              # carry residual to layer+1
    o_ref[...] = out3.astype(o_ref.dtype)            # HBM writeback only at end


def gpt2_transformer_stack(x, stack, cfg, batch_block=None):
    B, T, C = x.shape
    L = cfg["n_layer"]
    F = 4 * C
    if batch_block is None:
        # Merge the whole batch into each block: maximizes MXU rows per dot.
        # TODO(synk): on v7x set batch_block = B // 2 so the leading "parallel"
        #             grid axis feeds both TensorCores.
        batch_block = B
    assert B % batch_block == 0

    kern = functools.partial(_gpt2_stack_kernel, n_head=cfg["n_head"])
    x_spec = pl.BlockSpec((batch_block, T, C), lambda b, l: (b, 0, 0))

    def wspec(*shape):
        return pl.BlockSpec((1,) + shape, lambda b, l: (l, 0, 0))

    return pl.pallas_call(
        kern,
        out_shape=jax.ShapeDtypeStruct((B, T, C), jnp.float32),
        grid=(B // batch_block, L),
        in_specs=[
            x_spec,
            wspec(1, C), wspec(1, C),             # ln1 gamma / beta
            wspec(C, 3 * C), wspec(1, 3 * C),     # W_qkv / b_qkv (scale folded)
            wspec(C, C), wspec(1, C),             # W_attn_proj / b_attn_proj
            wspec(1, C), wspec(1, C),             # ln2 gamma / beta
            wspec(C, F), wspec(1, F),             # W_fc / b_fc
            wspec(F, C), wspec(1, C),             # W_mlp_proj / b_mlp_proj
        ],
        out_specs=x_spec,
        scratch_shapes=[pltpu.VMEM((batch_block, T, C), jnp.float32)],
        compiler_params=pltpu.CompilerParams(
            dimension_semantics=("parallel", "arbitrary")),
    )(x,
      stack["ln1_g"], stack["ln1_b"], stack["attn_w"], stack["attn_b"],
      stack["attn_proj_w"], stack["attn_proj_b"],
      stack["ln2_g"], stack["ln2_b"], stack["fc_w"], stack["fc_b"],
      stack["proj_w"], stack["proj_b"])


# -------------------- final LN fused into the lm_head --------------------

def _lnf_lm_head_kernel(x_ref, g_ref, b_ref, w_ref, o_ref):
    # LayerNorm applied per (tm, C) tile inside the lm_head kernel: the VPU
    # LN work hides under the MXU matmul and saves one full HBM round-trip.
    h = _layernorm_f32(x_ref[...].astype(jnp.float32), g_ref[...], b_ref[...])
    o_ref[...] = jnp.dot(h.astype(jnp.bfloat16), w_ref[...],
                         preferred_element_type=jnp.float32).astype(o_ref.dtype)


def lnf_lm_head(x2d, lnf_g, lnf_b, w_bf16, vocab_size, tm=256, tn=512):
    M, C = x2d.shape
    Vp = w_bf16.shape[1]          # vocab zero-padded to a multiple of tn
    tn = min(tn, Vp)
    assert Vp % tn == 0
    if M <= tm:
        tm, Mp, xp = M, M, x2d    # small M: one full-dim row tile
    else:
        Mp = ((M + tm - 1) // tm) * tm
        xp = jnp.pad(x2d, ((0, Mp - M), (0, 0))) if Mp != M else x2d

    out = pl.pallas_call(
        _lnf_lm_head_kernel,
        out_shape=jax.ShapeDtypeStruct((Mp, Vp), jnp.float32),
        grid=(Mp // tm, Vp // tn),
        in_specs=[pl.BlockSpec((tm, C), lambda i, j: (i, 0)),
                  pl.BlockSpec((1, C), lambda i, j: (0, 0)),
                  pl.BlockSpec((1, C), lambda i, j: (0, 0)),
                  pl.BlockSpec((C, tn), lambda i, j: (0, j))],
        out_specs=pl.BlockSpec((tm, tn), lambda i, j: (i, j)),
        compiler_params=pltpu.CompilerParams(
            dimension_semantics=("parallel", "parallel")),
    )(xp, lnf_g, lnf_b, w_bf16)
    return out[:M, :vocab_size]


# -------------------- model --------------------

CONFIG = {
    "vocab_size": 512,   # small synthetic config (same structure as GPT-2 Small)
    "n_embd": 128,
    "n_layer": 2,
    "n_head": 4,
    "n_ctx": 16,
    "dropout": 0.1,
    "qkv_bias": True,
}

LM_HEAD_TN = 512         # vocab tile size; lm_head weight is padded to this


def init_params(key, cfg):
    C, V, L = cfg["n_embd"], cfg["vocab_size"], cfg["n_layer"]

    def norm(k, shape):
        return 0.02 * jax.random.normal(k, shape, dtype=jnp.float32)

    keys = jax.random.split(key, 3 + L)
    params = {
        "wte": norm(keys[0], (V, C)),
        "wpe": norm(keys[1], (cfg["n_ctx"], C)),
        "lnf_g": jnp.ones((C,), jnp.float32),
        "lnf_b": jnp.zeros((C,), jnp.float32),
        "lm_head_w": norm(keys[2], (C, V)),          # (in, out), no bias
        "blocks": [],
    }
    for li in range(L):
        bk = jax.random.split(keys[3 + li], 8)
        params["blocks"].append({
            "ln1_g": jnp.ones((C,), jnp.float32),
            "ln1_b": jnp.zeros((C,), jnp.float32),
            "attn_w": norm(bk[0], (C, 3 * C)),
            "attn_b": norm(bk[1], (3 * C,)),
            "attn_proj_w": norm(bk[2], (C, C)),
            "attn_proj_b": norm(bk[3], (C,)),
            "ln2_g": jnp.ones((C,), jnp.float32),
            "ln2_b": jnp.zeros((C,), jnp.float32),
            "fc_w": norm(bk[4], (C, 4 * C)),
            "fc_b": norm(bk[5], (4 * C,)),
            "proj_w": norm(bk[6], (4 * C, C)),
            "proj_b": norm(bk[7], (C,)),
        })
    return params


def prepare_params(params, cfg):
    """One-time prep: stack per-layer weights on a leading L axis (pipelined
    over the layer grid axis), cast MXU operands to bf16, fold 1/sqrt(hs) into
    the Q columns, reshape biases to (1, N), and zero-pad the lm_head vocab."""
    C, V = cfg["n_embd"], cfg["vocab_size"]
    hs = C // cfg["n_head"]
    qscale = 1.0 / math.sqrt(hs)

    def stacked(name, fn=lambda a: a):
        return jnp.stack([fn(b[name]) for b in params["blocks"]], axis=0)

    Vp = ((V + LM_HEAD_TN - 1) // LM_HEAD_TN) * LM_HEAD_TN
    lm_w = jnp.pad(params["lm_head_w"], ((0, 0), (0, Vp - V)))

    return {
        "wte": params["wte"],
        "wpe": params["wpe"],
        "lnf_g": params["lnf_g"].reshape(1, C),
        "lnf_b": params["lnf_b"].reshape(1, C),
        "lm_head_w": lm_w.astype(jnp.bfloat16),
        "stack": {
            "ln1_g": stacked("ln1_g", lambda a: a.reshape(1, C)),
            "ln1_b": stacked("ln1_b", lambda a: a.reshape(1, C)),
            "attn_w": stacked(
                "attn_w", lambda a: a.at[:, :C].multiply(qscale)).astype(jnp.bfloat16),
            "attn_b": stacked(
                "attn_b", lambda a: a.at[:C].multiply(qscale).reshape(1, 3 * C)),
            "attn_proj_w": stacked("attn_proj_w").astype(jnp.bfloat16),
            "attn_proj_b": stacked("attn_proj_b", lambda a: a.reshape(1, C)),
            "ln2_g": stacked("ln2_g", lambda a: a.reshape(1, C)),
            "ln2_b": stacked("ln2_b", lambda a: a.reshape(1, C)),
            "fc_w": stacked("fc_w").astype(jnp.bfloat16),
            "fc_b": stacked("fc_b", lambda a: a.reshape(1, 4 * C)),
            "proj_w": stacked("proj_w").astype(jnp.bfloat16),
            "proj_b": stacked("proj_b", lambda a: a.reshape(1, C)),
        },
    }


def gpt2_forward(params, idx, cfg):
    B, T = idx.shape
    C, V = cfg["n_embd"], cfg["vocab_size"]
    assert T <= cfg["n_ctx"], "sequence length exceeds n_ctx"

    # Embedding gather + add (data-dependent gather kept in plain JAX);
    # embedding dropout == identity (eval mode).
    tok_emb = jnp.take(params["wte"], idx, axis=0)          # (B, T, C)
    x = (tok_emb + params["wpe"][:T][None, :, :]).astype(jnp.float32)

    # Whole transformer stack: ONE fused pallas_call (grid over layers).
    x = gpt2_transformer_stack(x, params["stack"], cfg)

    # Final LayerNorm fused into the (row, vocab)-tiled lm_head matmul.
    logits = lnf_lm_head(x.reshape(B * T, C), params["lnf_g"], params["lnf_b"],
                         params["lm_head_w"], V)
    return logits.reshape(B, T, V)


if __name__ == "__main__":
    key = jax.random.PRNGKey(0)
    pkey, ikey = jax.random.split(key)

    params = prepare_params(init_params(pkey, CONFIG), CONFIG)

    B, T = 2, 8
    idx = jax.random.randint(ikey, (B, T), 0, CONFIG["vocab_size"], dtype=jnp.int32)

    fwd = jax.jit(functools.partial(gpt2_forward, cfg=CONFIG))
    logits = fwd(params, idx)
    jax.block_until_ready(logits)

    assert logits.shape == (B, T, CONFIG["vocab_size"])
    assert bool(jnp.all(jnp.isfinite(logits)))
    print("KERNEL_OK")
</pallas_src>

<mosaic_0001>
module attributes {stable_mosaic.version = 11 : i64} {
  func.func @_gpt2_stack_kernel(%arg0: i32, %arg1: i32, %arg2: memref<2x8x128xf32, #tpu.memory_space<vmem>>, %arg3: memref<1x1x128xf32, #tpu.memory_space<vmem>>, %arg4: memref<1x1x128xf32, #tpu.memory_space<vmem>>, %arg5: memref<1x128x384xbf16, #tpu.memory_space<vmem>>, %arg6: memref<1x1x384xf32, #tpu.memory_space<vmem>>, %arg7: memref<1x128x128xbf16, #tpu.memory_space<vmem>>, %arg8: memref<1x1x128xf32, #tpu.memory_space<vmem>>, %arg9: memref<1x1x128xf32, #tpu.memory_space<vmem>>, %arg10: memref<1x1x128xf32, #tpu.memory_space<vmem>>, %arg11: memref<1x128x512xbf16, #tpu.memory_space<vmem>>, %arg12: memref<1x1x512xf32, #tpu.memory_space<vmem>>, %arg13: memref<1x512x128xbf16, #tpu.memory_space<vmem>>, %arg14: memref<1x1x128xf32, #tpu.memory_space<vmem>>, %arg15: memref<2x8x128xf32, #tpu.memory_space<vmem>>, %arg16: memref<2x8x128xf32, #tpu.memory_space<vmem>>) attributes {dimension_semantics = [#tpu.dimension_semantics<parallel>, #tpu.dimension_semantics<arbitrary>], iteration_bounds = array<i64: 1, 2>, scalar_prefetch = 0 : i64, scratch_operands = 1 : i64, tpu.core_type = #tpu.core_type<tc>, window_params = [{transform_indices = @transform_0, window_bounds = array<i64: 2, 8, 128>}, {transform_indices = @transform_1, window_bounds = array<i64: 1, 1, 128>}, {transform_indices = @transform_2, window_bounds = array<i64: 1, 1, 128>}, {transform_indices = @transform_3, window_bounds = array<i64: 1, 128, 384>}, {transform_indices = @transform_4, window_bounds = array<i64: 1, 1, 384>}, {transform_indices = @transform_5, window_bounds = array<i64: 1, 128, 128>}, {transform_indices = @transform_6, window_bounds = array<i64: 1, 1, 128>}, {transform_indices = @transform_7, window_bounds = array<i64: 1, 1, 128>}, {transform_indices = @transform_8, window_bounds = array<i64: 1, 1, 128>}, {transform_indices = @transform_9, window_bounds = array<i64: 1, 128, 512>}, {transform_indices = @transform_10, window_bounds = array<i64: 1, 1, 512>}, {transform_indices = @transform_11, window_bounds = array<i64: 1, 512, 128>}, {transform_indices = @transform_12, window_bounds = array<i64: 1, 1, 128>}, {transform_indices = @transform_13, window_bounds = array<i64: 2, 8, 128>}]} {
    %c0_i32 = arith.constant 0 : i32
    %0 = arith.cmpi eq, %arg1, %c0_i32 : i32
    %1 = arith.extui %0 : i1 to i32
    %c0_i32_0 = arith.constant 0 : i32
    %2 = arith.cmpi ne, %1, %c0_i32_0 : i32
    scf.if %2 {
      %c0_98 = arith.constant 0 : index
      %c0_99 = arith.constant 0 : index
      %c0_100 = arith.constant 0 : index
      %262 = vector.load %arg2[%c0_98, %c0_99, %c0_100] : memref<2x8x128xf32, #tpu.memory_space<vmem>>, vector<2x8x128xf32>
      %c0_101 = arith.constant 0 : index
      %c0_102 = arith.constant 0 : index
      %c0_103 = arith.constant 0 : index
      %263 = vector.load %arg16[%c0_101, %c0_102, %c0_103] : memref<2x8x128xf32, #tpu.memory_space<vmem>>, vector<2x8x128xf32>
      tpu.vector_store %arg16[%c0_101, %c0_102, %c0_103], %262 {strides = array<i32>} : memref<2x8x128xf32, #tpu.memory_space<vmem>>, vector<2x8x128xf32>,
    } else {
    }
    %c0 = arith.constant 0 : index
    %c0_1 = arith.constant 0 : index
    %c0_2 = arith.constant 0 : index
    %3 = vector.load %arg16[%c0, %c0_1, %c0_2] : memref<2x8x128xf32, #tpu.memory_space<vmem>>, vector<2x8x128xf32>
    %4 = vector.shape_cast %3 : vector<2x8x128xf32> to vector<16x128xf32>
    %c0_3 = arith.constant 0 : index
    %c0_4 = arith.constant 0 : index
    %c0_5 = arith.constant 0 : index
    %5 = vector.load %arg3[%c0_3, %c0_4, %c0_5] : memref<1x1x128xf32, #tpu.memory_space<vmem>>, vector<1x1x128xf32>
    %6 = vector.shape_cast %5 : vector<1x1x128xf32> to vector<1x128xf32>
    %c0_6 = arith.constant 0 : index
    %c0_7 = arith.constant 0 : index
    %c0_8 = arith.constant 0 : index
    %7 = vector.load %arg4[%c0_6, %c0_7, %c0_8] : memref<1x1x128xf32, #tpu.memory_space<vmem>>, vector<1x1x128xf32>
    %8 = vector.shape_cast %7 : vector<1x1x128xf32> to vector<1x128xf32>
    %cst = arith.constant dense<0.000000e+00> : vector<16xf32>
    %9 = vector.multi_reduction <add>, %4, %cst [1] : vector<16x128xf32> to vector<16xf32>
    %10 = vector.shape_cast %9 : vector<16xf32> to vector<16x1xf32>
    %cst_9 = arith.constant 1.280000e+02 : f32
    %11 = vector.broadcast %cst_9 : f32 to vector<16x1xf32>
    %12 = arith.divf %10, %11 : vector<16x1xf32>
    %13 = vector.broadcast %12 : vector<16x1xf32> to vector<16x128xf32>
    %14 = arith.subf %4, %13 : vector<16x128xf32>
    %15 = arith.mulf %14, %14 : vector<16x128xf32>
    %cst_10 = arith.constant dense<0.000000e+00> : vector<16xf32>
    %16 = vector.multi_reduction <add>, %15, %cst_10 [1] : vector<16x128xf32> to vector<16xf32>
    %17 = vector.shape_cast %16 : vector<16xf32> to vector<16x1xf32>
    %cst_11 = arith.constant 1.280000e+02 : f32
    %18 = vector.broadcast %cst_11 : f32 to vector<16x1xf32>
    %19 = arith.divf %17, %18 : vector<16x1xf32>
    %20 = vector.broadcast %12 : vector<16x1xf32> to vector<16x128xf32>
    %21 = arith.subf %4, %20 : vector<16x128xf32>
    %cst_12 = arith.constant 9.99999974E-6 : f32
    %22 = vector.broadcast %cst_12 : f32 to vector<16x1xf32>
    %23 = arith.addf %19, %22 : vector<16x1xf32>
    %24 = math.rsqrt %23 : vector<16x1xf32>
    %25 = vector.broadcast %24 : vector<16x1xf32> to vector<16x128xf32>
    %26 = arith.mulf %21, %25 : vector<16x128xf32>
    %27 = vector.broadcast %6 : vector<1x128xf32> to vector<16x128xf32>
    %28 = arith.mulf %26, %27 : vector<16x128xf32>
    %29 = vector.broadcast %8 : vector<1x128xf32> to vector<16x128xf32>
    %30 = arith.addf %28, %29 : vector<16x128xf32>
    %31 = arith.truncf %30 : vector<16x128xf32> to vector<16x128xbf16>
    %c0_13 = arith.constant 0 : index
    %c0_14 = arith.constant 0 : index
    %c0_15 = arith.constant 0 : index
    %32 = vector.load %arg5[%c0_13, %c0_14, %c0_15] : memref<1x128x384xbf16, #tpu.memory_space<vmem>>, vector<1x128x384xbf16>
    %33 = vector.shape_cast %32 : vector<1x128x384xbf16> to vector<128x384xbf16>
    %cst_16 = arith.constant dense<0.000000e+00> : vector<16x384xf32>
    %34 = tpu.matmul %31, %33, %cst_16 {dimension_numbers = #tpu.dot_dimension_numbers<[1], [0], [0], [1], [0, 0, 1, 1], [], []>} : vector<16x128xbf16>, vector<128x384xbf16>, vector<16x384xf32> -> vector<16x384xf32>
    %c0_17 = arith.constant 0 : index
    %c0_18 = arith.constant 0 : index
    %c0_19 = arith.constant 0 : index
    %35 = vector.load %arg6[%c0_17, %c0_18, %c0_19] : memref<1x1x384xf32, #tpu.memory_space<vmem>>, vector<1x1x384xf32>
    %36 = vector.shape_cast %35 : vector<1x1x384xf32> to vector<1x384xf32>
    %37 = vector.broadcast %36 : vector<1x384xf32> to vector<16x384xf32>
    %38 = arith.addf %34, %37 : vector<16x384xf32>
    %39 = tpu.iota {dimensions = array<i32: 0>} : vector<8x8xi32>
    %40 = tpu.iota {dimensions = array<i32: 1>} : vector<8x8xi32>
    %41 = arith.cmpi sle, %40, %39 : vector<8x8xi32>
    %42 = vector.shape_cast %41 : vector<8x8xi1> to vector<1x8x8xi1>
    %c0_20 = arith.constant 0 : index
    %c0_21 = arith.constant 0 : index
    %c0_22 = arith.constant 0 : index
    %43 = vector.load %arg7[%c0_20, %c0_21, %c0_22] : memref<1x128x128xbf16, #tpu.memory_space<vmem>>, vector<1x128x128xbf16>
    %44 = vector.shape_cast %43 : vector<1x128x128xbf16> to vector<128x128xbf16>
    %cst_23 = arith.constant 0.000000e+00 : f32
    %45 = vector.broadcast %cst_23 : f32 to vector<16x128xf32>
    %46 = vector.extract_strided_slice %38 {offsets = [0, 0], sizes = [16, 32], strides = [1, 1]} : vector<16x384xf32> to vector<16x32xf32>
    %47 = vector.shape_cast %46 : vector<16x32xf32> to vector<2x8x32xf32>
    %48 = arith.truncf %47 : vector<2x8x32xf32> to vector<2x8x32xbf16>
    %49 = vector.extract_strided_slice %38 {offsets = [0, 128], sizes = [16, 32], strides = [1, 1]} : vector<16x384xf32> to vector<16x32xf32>
    %50 = vector.shape_cast %49 : vector<16x32xf32> to vector<2x8x32xf32>
    %51 = arith.truncf %50 : vector<2x8x32xf32> to vector<2x8x32xbf16>
    %52 = vector.extract_strided_slice %38 {offsets = [0, 256], sizes = [16, 32], strides = [1, 1]} : vector<16x384xf32> to vector<16x32xf32>
    %53 = vector.shape_cast %52 : vector<16x32xf32> to vector<2x8x32xf32>
    %54 = arith.truncf %53 : vector<2x8x32xf32> to vector<2x8x32xbf16>
    "tpu.trace_start"() <{level = 10 : i32, message = "bqd,bkd->bqk"}> : () -> ()
    %cst_24 = arith.constant dense<0.000000e+00> : vector<2x8x8xf32>
    %55 = tpu.matmul %48, %51, %cst_24 {dimension_numbers = #tpu.dot_dimension_numbers<[2], [2], [1], [1], [0, 0, 0, 1, 1, 1], [0], [0]>} : vector<2x8x32xbf16>, vector<2x8x32xbf16>, vector<2x8x8xf32> -> vector<2x8x8xf32>
    %cst_25 = arith.constant -1.000000e+30 : f32
    "tpu.trace_stop"() : () -> ()
    %56 = vector.shape_cast %42 : vector<1x8x8xi1> to vector<1x8x8xi1>
    %57 = vector.broadcast %56 : vector<1x8x8xi1> to vector<2x8x8xi1>
    %58 = vector.broadcast %cst_25 : f32 to vector<2x8x8xf32>
    %59 = arith.select %57, %55, %58 : vector<2x8x8xi1>, vector<2x8x8xf32>
    %cst_26 = arith.constant dense<0xFF800000> : vector<2x8xf32>
    %60 = vector.multi_reduction <maximumf>, %59, %cst_26 [2] : vector<2x8x8xf32> to vector<2x8xf32>
    %61 = vector.shape_cast %60 : vector<2x8xf32> to vector<2x8x1xf32>
    %62 = vector.broadcast %61 : vector<2x8x1xf32> to vector<2x8x8xf32>
    %63 = arith.subf %59, %62 : vector<2x8x8xf32>
    %64 = math.exp %63 : vector<2x8x8xf32>
    %cst_27 = arith.constant dense<0.000000e+00> : vector<2x8xf32>
    %65 = vector.multi_reduction <add>, %64, %cst_27 [2] : vector<2x8x8xf32> to vector<2x8xf32>
    %66 = vector.shape_cast %65 : vector<2x8xf32> to vector<2x8x1xf32>
    %67 = tpu.reciprocal %66 {approx = true} : vector<2x8x1xf32> -> vector<2x8x1xf32>
    %68 = vector.broadcast %67 : vector<2x8x1xf32> to vector<2x8x8xf32>
    %69 = arith.mulf %64, %68 : vector<2x8x8xf32>
    %70 = arith.truncf %69 : vector<2x8x8xf32> to vector<2x8x8xbf16>
    "tpu.trace_start"() <{level = 10 : i32, message = "bqk,bkd->bqd"}> : () -> ()
    %cst_28 = arith.constant dense<0.000000e+00> : vector<2x8x32xf32>
    %71 = tpu.matmul %70, %54, %cst_28 {dimension_numbers = #tpu.dot_dimension_numbers<[2], [1], [1], [2], [0, 0, 0, 1, 1, 2], [0], [0]>} : vector<2x8x8xbf16>, vector<2x8x32xbf16>, vector<2x8x32xf32> -> vector<2x8x32xf32>
    "tpu.trace_stop"() : () -> ()
    %72 = vector.shape_cast %71 : vector<2x8x32xf32> to vector<16x32xf32>
    %73 = arith.truncf %72 : vector<16x32xf32> to vector<16x32xbf16>
    %74 = vector.extract_strided_slice %44 {offsets = [0, 0], sizes = [32, 128], strides = [1, 1]} : vector<128x128xbf16> to vector<32x128xbf16>
    %cst_29 = arith.constant dense<0.000000e+00> : vector<16x128xf32>
    %75 = tpu.matmul %73, %74, %cst_29 {dimension_numbers = #tpu.dot_dimension_numbers<[1], [0], [0], [1], [0, 0, 1, 1], [], []>} : vector<16x32xbf16>, vector<32x128xbf16>, vector<16x128xf32> -> vector<16x128xf32>
    %76 = arith.addf %45, %75 : vector<16x128xf32>
    %77 = vector.extract_strided_slice %38 {offsets = [0, 32], sizes = [16, 32], strides = [1, 1]} : vector<16x384xf32> to vector<16x32xf32>
    %78 = vector.shape_cast %77 : vector<16x32xf32> to vector<2x8x32xf32>
    %79 = arith.truncf %78 : vector<2x8x32xf32> to vector<2x8x32xbf16>
    %80 = vector.extract_strided_slice %38 {offsets = [0, 160], sizes = [16, 32], strides = [1, 1]} : vector<16x384xf32> to vector<16x32xf32>
    %81 = vector.shape_cast %80 : vector<16x32xf32> to vector<2x8x32xf32>
    %82 = arith.truncf %81 : vector<2x8x32xf32> to vector<2x8x32xbf16>
    %83 = vector.extract_strided_slice %38 {offsets = [0, 288], sizes = [16, 32], strides = [1, 1]} : vector<16x384xf32> to vector<16x32xf32>
    %84 = vector.shape_cast %83 : vector<16x32xf32> to vector<2x8x32xf32>
    %85 = arith.truncf %84 : vector<2x8x32xf32> to vector<2x8x32xbf16>
    "tpu.trace_start"() <{level = 10 : i32, message = "bqd,bkd->bqk"}> : () -> ()
    %cst_30 = arith.constant dense<0.000000e+00> : vector<2x8x8xf32>
    %86 = tpu.matmul %79, %82, %cst_30 {dimension_numbers = #tpu.dot_dimension_numbers<[2], [2], [1], [1], [0, 0, 0, 1, 1, 1], [0], [0]>} : vector<2x8x32xbf16>, vector<2x8x32xbf16>, vector<2x8x8xf32> -> vector<2x8x8xf32>
    %cst_31 = arith.constant -1.000000e+30 : f32
    "tpu.trace_stop"() : () -> ()
    %87 = vector.shape_cast %42 : vector<1x8x8xi1> to vector<1x8x8xi1>
    %88 = vector.broadcast %87 : vector<1x8x8xi1> to vector<2x8x8xi1>
    %89 = vector.broadcast %cst_31 : f32 to vector<2x8x8xf32>
    %90 = arith.select %88, %86, %89 : vector<2x8x8xi1>, vector<2x8x8xf32>
    %cst_32 = arith.constant dense<0xFF800000> : vector<2x8xf32>
    %91 = vector.multi_reduction <maximumf>, %90, %cst_32 [2] : vector<2x8x8xf32> to vector<2x8xf32>
    %92 = vector.shape_cast %91 : vector<2x8xf32> to vector<2x8x1xf32>
    %93 = vector.broadcast %92 : vector<2x8x1xf32> to vector<2x8x8xf32>
    %94 = arith.subf %90, %93 : vector<2x8x8xf32>
    %95 = math.exp %94 : vector<2x8x8xf32>
    %cst_33 = arith.constant dense<0.000000e+00> : vector<2x8xf32>
    %96 = vector.multi_reduction <add>, %95, %cst_33 [2] : vector<2x8x8xf32> to vector<2x8xf32>
    %97 = vector.shape_cast %96 : vector<2x8xf32> to vector<2x8x1xf32>
    %98 = tpu.reciprocal %97 {approx = true} : vector<2x8x1xf32> -> vector<2x8x1xf32>
    %99 = vector.broadcast %98 : vector<2x8x1xf32> to vector<2x8x8xf32>
    %100 = arith.mulf %95, %99 : vector<2x8x8xf32>
    %101 = arith.truncf %100 : vector<2x8x8xf32> to vector<2x8x8xbf16>
    "tpu.trace_start"() <{level = 10 : i32, message = "bqk,bkd->bqd"}> : () -> ()
    %cst_34 = arith.constant dense<0.000000e+00> : vector<2x8x32xf32>
    %102 = tpu.matmul %101, %85, %cst_34 {dimension_numbers = #tpu.dot_dimension_numbers<[2], [1], [1], [2], [0, 0, 0, 1, 1, 2], [0], [0]>} : vector<2x8x8xbf16>, vector<2x8x32xbf16>, vector<2x8x32xf32> -> vector<2x8x32xf32>
    "tpu.trace_stop"() : () -> ()
    %103 = vector.shape_cast %102 : vector<2x8x32xf32> to vector<16x32xf32>
    %104 = arith.truncf %103 : vector<16x32xf32> to vector<16x32xbf16>
    %105 = vector.extract_strided_slice %44 {offsets = [32, 0], sizes = [32, 128], strides = [1, 1]} : vector<128x128xbf16> to vector<32x128xbf16>
    %cst_35 = arith.constant dense<0.000000e+00> : vector<16x128xf32>
    %106 = tpu.matmul %104, %105, %cst_35 {dimension_numbers = #tpu.dot_dimension_numbers<[1], [0], [0], [1], [0, 0, 1, 1], [], []>} : vector<16x32xbf16>, vector<32x128xbf16>, vector<16x128xf32> -> vector<16x128xf32>
    %107 = arith.addf %76, %106 : vector<16x128xf32>
    %108 = vector.extract_strided_slice %38 {offsets = [0, 64], sizes = [16, 32], strides = [1, 1]} : vector<16x384xf32> to vector<16x32xf32>
    %109 = vector.shape_cast %108 : vector<16x32xf32> to vector<2x8x32xf32>
    %110 = arith.truncf %109 : vector<2x8x32xf32> to vector<2x8x32xbf16>
    %111 = vector.extract_strided_slice %38 {offsets = [0, 192], sizes = [16, 32], strides = [1, 1]} : vector<16x384xf32> to vector<16x32xf32>
    %112 = vector.shape_cast %111 : vector<16x32xf32> to vector<2x8x32xf32>
    %113 = arith.truncf %112 : vector<2x8x32xf32> to vector<2x8x32xbf16>
    %114 = vector.extract_strided_slice %38 {offsets = [0, 320], sizes = [16, 32], strides = [1, 1]} : vector<16x384xf32> to vector<16x32xf32>
    %115 = vector.shape_cast %114 : vector<16x32xf32> to vector<2x8x32xf32>
    %116 = arith.truncf %115 : vector<2x8x32xf32> to vector<2x8x32xbf16>
    "tpu.trace_start"() <{level = 10 : i32, message = "bqd,bkd->bqk"}> : () -> ()
    %cst_36 = arith.constant dense<0.000000e+00> : vector<2x8x8xf32>
    %117 = tpu.matmul %110, %113, %cst_36 {dimension_numbers = #tpu.dot_dimension_numbers<[2], [2], [1], [1], [0, 0, 0, 1, 1, 1], [0], [0]>} : vector<2x8x32xbf16>, vector<2x8x32xbf16>, vector<2x8x8xf32> -> vector<2x8x8xf32>
    %cst_37 = arith.constant -1.000000e+30 : f32
    "tpu.trace_stop"() : () -> ()
    %118 = vector.shape_cast %42 : vector<1x8x8xi1> to vector<1x8x8xi1>
    %119 = vector.broadcast %118 : vector<1x8x8xi1> to vector<2x8x8xi1>
    %120 = vector.broadcast %cst_37 : f32 to vector<2x8x8xf32>
    %121 = arith.select %119, %117, %120 : vector<2x8x8xi1>, vector<2x8x8xf32>
    %cst_38 = arith.constant dense<0xFF800000> : vector<2x8xf32>
    %122 = vector.multi_reduction <maximumf>, %121, %cst_38 [2] : vector<2x8x8xf32> to vector<2x8xf32>
    %123 = vector.shape_cast %122 : vector<2x8xf32> to vector<2x8x1xf32>
    %124 = vector.broadcast %123 : vector<2x8x1xf32> to vector<2x8x8xf32>
    %125 = arith.subf %121, %124 : vector<2x8x8xf32>
    %126 = math.exp %125 : vector<2x8x8xf32>
    %cst_39 = arith.constant dense<0.000000e+00> : vector<2x8xf32>
    %127 = vector.multi_reduction <add>, %126, %cst_39 [2] : vector<2x8x8xf32> to vector<2x8xf32>
    %128 = vector.shape_cast %127 : vector<2x8xf32> to vector<2x8x1xf32>
    %129 = tpu.reciprocal %128 {approx = true} : vector<2x8x1xf32> -> vector<2x8x1xf32>
    %130 = vector.broadcast %129 : vector<2x8x1xf32> to vector<2x8x8xf32>
    %131 = arith.mulf %126, %130 : vector<2x8x8xf32>
    %132 = arith.truncf %131 : vector<2x8x8xf32> to vector<2x8x8xbf16>
    "tpu.trace_start"() <{level = 10 : i32, message = "bqk,bkd->bqd"}> : () -> ()
    %cst_40 = arith.constant dense<0.000000e+00> : vector<2x8x32xf32>
    %133 = tpu.matmul %132, %116, %cst_40 {dimension_numbers = #tpu.dot_dimension_numbers<[2], [1], [1], [2], [0, 0, 0, 1, 1, 2], [0], [0]>} : vector<2x8x8xbf16>, vector<2x8x32xbf16>, vector<2x8x32xf32> -> vector<2x8x32xf32>
    "tpu.trace_stop"() : () -> ()
    %134 = vector.shape_cast %133 : vector<2x8x32xf32> to vector<16x32xf32>
    %135 = arith.truncf %134 : vector<16x32xf32> to vector<16x32xbf16>
    %136 = vector.extract_strided_slice %44 {offsets = [64, 0], sizes = [32, 128], strides = [1, 1]} : vector<128x128xbf16> to vector<32x128xbf16>
    %cst_41 = arith.constant dense<0.000000e+00> : vector<16x128xf32>
    %137 = tpu.matmul %135, %136, %cst_41 {dimension_numbers = #tpu.dot_dimension_numbers<[1], [0], [0], [1], [0, 0, 1, 1], [], []>} : vector<16x32xbf16>, vector<32x128xbf16>, vector<16x128xf32> -> vector<16x128xf32>
    %138 = arith.addf %107, %137 : vector<16x128xf32>
    %139 = vector.extract_strided_slice %38 {offsets = [0, 96], sizes = [16, 32], strides = [1, 1]} : vector<16x384xf32> to vector<16x32xf32>
    %140 = vector.shape_cast %139 : vector<16x32xf32> to vector<2x8x32xf32>
    %141 = arith.truncf %140 : vector<2x8x32xf32> to vector<2x8x32xbf16>
    %142 = vector.extract_strided_slice %38 {offsets = [0, 224], sizes = [16, 32], strides = [1, 1]} : vector<16x384xf32> to vector<16x32xf32>
    %143 = vector.shape_cast %142 : vector<16x32xf32> to vector<2x8x32xf32>
    %144 = arith.truncf %143 : vector<2x8x32xf32> to vector<2x8x32xbf16>
    %145 = vector.extract_strided_slice %38 {offsets = [0, 352], sizes = [16, 32], strides = [1, 1]} : vector<16x384xf32> to vector<16x32xf32>
    %146 = vector.shape_cast %145 : vector<16x32xf32> to vector<2x8x32xf32>
    %147 = arith.truncf %146 : vector<2x8x32xf32> to vector<2x8x32xbf16>
    "tpu.trace_start"() <{level = 10 : i32, message = "bqd,bkd->bqk"}> : () -> ()
    %cst_42 = arith.constant dense<0.000000e+00> : vector<2x8x8xf32>
    %148 = tpu.matmul %141, %144, %cst_42 {dimension_numbers = #tpu.dot_dimension_numbers<[2], [2], [1], [1], [0, 0, 0, 1, 1, 1], [0], [0]>} : vector<2x8x32xbf16>, vector<2x8x32xbf16>, vector<2x8x8xf32> -> vector<2x8x8xf32>
    %cst_43 = arith.constant -1.000000e+30 : f32
    "tpu.trace_stop"() : () -> ()
    %149 = vector.shape_cast %42 : vector<1x8x8xi1> to vector<1x8x8xi1>
    %150 = vector.broadcast %149 : vector<1x8x8xi1> to vector<2x8x8xi1>
    %151 = vector.broadcast %cst_43 : f32 to vector<2x8x8xf32>
    %152 = arith.select %150, %148, %151 : vector<2x8x8xi1>, vector<2x8x8xf32>
    %cst_44 = arith.constant dense<0xFF800000> : vector<2x8xf32>
    %153 = vector.multi_reduction <maximumf>, %152, %cst_44 [2] : vector<2x8x8xf32> to vector<2x8xf32>
    %154 = vector.shape_cast %153 : vector<2x8xf32> to vector<2x8x1xf32>
    %155 = vector.broadcast %154 : vector<2x8x1xf32> to vector<2x8x8xf32>
    %156 = arith.subf %152, %155 : vector<2x8x8xf32>
    %157 = math.exp %156 : vector<2x8x8xf32>
    %cst_45 = arith.constant dense<0.000000e+00> : vector<2x8xf32>
    %158 = vector.multi_reduction <add>, %157, %cst_45 [2] : vector<2x8x8xf32> to vector<2x8xf32>
    %159 = vector.shape_cast %158 : vector<2x8xf32> to vector<2x8x1xf32>
    %160 = tpu.reciprocal %159 {approx = true} : vector<2x8x1xf32> -> vector<2x8x1xf32>
    %161 = vector.broadcast %160 : vector<2x8x1xf32> to vector<2x8x8xf32>
    %162 = arith.mulf %157, %161 : vector<2x8x8xf32>
    %163 = arith.truncf %162 : vector<2x8x8xf32> to vector<2x8x8xbf16>
    "tpu.trace_start"() <{level = 10 : i32, message = "bqk,bkd->bqd"}> : () -> ()
    %cst_46 = arith.constant dense<0.000000e+00> : vector<2x8x32xf32>
    %164 = tpu.matmul %163, %147, %cst_46 {dimension_numbers = #tpu.dot_dimension_numbers<[2], [1], [1], [2], [0, 0, 0, 1, 1, 2], [0], [0]>} : vector<2x8x8xbf16>, vector<2x8x32xbf16>, vector<2x8x32xf32> -> vector<2x8x32xf32>
    "tpu.trace_stop"() : () -> ()
    %165 = vector.shape_cast %164 : vector<2x8x32xf32> to vector<16x32xf32>
    %166 = arith.truncf %165 : vector<16x32xf32> to vector<16x32xbf16>
    %167 = vector.extract_strided_slice %44 {offsets = [96, 0], sizes = [32, 128], strides = [1, 1]} : vector<128x128xbf16> to vector<32x128xbf16>
    %cst_47 = arith.constant dense<0.000000e+00> : vector<16x128xf32>
    %168 = tpu.matmul %166, %167, %cst_47 {dimension_numbers = #tpu.dot_dimension_numbers<[1], [0], [0], [1], [0, 0, 1, 1], [], []>} : vector<16x32xbf16>, vector<32x128xbf16>, vector<16x128xf32> -> vector<16x128xf32>
    %169 = arith.addf %138, %168 : vector<16x128xf32>
    %170 = arith.addf %4, %169 : vector<16x128xf32>
    %c0_48 = arith.constant 0 : index
    %c0_49 = arith.constant 0 : index
    %c0_50 = arith.constant 0 : index
    %171 = vector.load %arg8[%c0_48, %c0_49, %c0_50] : memref<1x1x128xf32, #tpu.memory_space<vmem>>, vector<1x1x128xf32>
    %172 = vector.shape_cast %171 : vector<1x1x128xf32> to vector<1x128xf32>
    %173 = vector.broadcast %172 : vector<1x128xf32> to vector<16x128xf32>
    %174 = arith.addf %170, %173 : vector<16x128xf32>
    %c0_51 = arith.constant 0 : index
    %c0_52 = arith.constant 0 : index
    %c0_53 = arith.constant 0 : index
    %175 = vector.load %arg9[%c0_51, %c0_52, %c0_53] : memref<1x1x128xf32, #tpu.memory_space<vmem>>, vector<1x1x128xf32>
    %176 = vector.shape_cast %175 : vector<1x1x128xf32> to vector<1x128xf32>
    %c0_54 = arith.constant 0 : index
    %c0_55 = arith.constant 0 : index
    %c0_56 = arith.constant 0 : index
    %177 = vector.load %arg10[%c0_54, %c0_55, %c0_56] : memref<1x1x128xf32, #tpu.memory_space<vmem>>, vector<1x1x128xf32>
    %178 = vector.shape_cast %177 : vector<1x1x128xf32> to vector<1x128xf32>
    %cst_57 = arith.constant dense<0.000000e+00> : vector<16xf32>
    %179 = vector.multi_reduction <add>, %174, %cst_57 [1] : vector<16x128xf32> to vector<16xf32>
    %180 = vector.shape_cast %179 : vector<16xf32> to vector<16x1xf32>
    %cst_58 = arith.constant 1.280000e+02 : f32
    %181 = vector.broadcast %cst_58 : f32 to vector<16x1xf32>
    %182 = arith.divf %180, %181 : vector<16x1xf32>
    %183 = vector.broadcast %182 : vector<16x1xf32> to vector<16x128xf32>
    %184 = arith.subf %174, %183 : vector<16x128xf32>
    %185 = arith.mulf %184, %184 : vector<16x128xf32>
    %cst_59 = arith.constant dense<0.000000e+00> : vector<16xf32>
    %186 = vector.multi_reduction <add>, %185, %cst_59 [1] : vector<16x128xf32> to vector<16xf32>
    %187 = vector.shape_cast %186 : vector<16xf32> to vector<16x1xf32>
    %cst_60 = arith.constant 1.280000e+02 : f32
    %188 = vector.broadcast %cst_60 : f32 to vector<16x1xf32>
    %189 = arith.divf %187, %188 : vector<16x1xf32>
    %190 = vector.broadcast %182 : vector<16x1xf32> to vector<16x128xf32>
    %191 = arith.subf %174, %190 : vector<16x128xf32>
    %cst_61 = arith.constant 9.99999974E-6 : f32
    %192 = vector.broadcast %cst_61 : f32 to vector<16x1xf32>
    %193 = arith.addf %189, %192 : vector<16x1xf32>
    %194 = math.rsqrt %193 : vector<16x1xf32>
    %195 = vector.broadcast %194 : vector<16x1xf32> to vector<16x128xf32>
    %196 = arith.mulf %191, %195 : vector<16x128xf32>
    %197 = vector.broadcast %176 : vector<1x128xf32> to vector<16x128xf32>
    %198 = arith.mulf %196, %197 : vector<16x128xf32>
    %199 = vector.broadcast %178 : vector<1x128xf32> to vector<16x128xf32>
    %200 = arith.addf %198, %199 : vector<16x128xf32>
    %201 = arith.truncf %200 : vector<16x128xf32> to vector<16x128xbf16>
    %c0_62 = arith.constant 0 : index
    %c0_63 = arith.constant 0 : index
    %c0_64 = arith.constant 0 : index
    %202 = vector.load %arg11[%c0_62, %c0_63, %c0_64] : memref<1x128x512xbf16, #tpu.memory_space<vmem>>, vector<1x128x512xbf16>
    %203 = vector.shape_cast %202 : vector<1x128x512xbf16> to vector<128x512xbf16>
    %cst_65 = arith.constant dense<0.000000e+00> : vector<16x512xf32>
    %204 = tpu.matmul %201, %203, %cst_65 {dimension_numbers = #tpu.dot_dimension_numbers<[1], [0], [0], [1], [0, 0, 1, 1], [], []>} : vector<16x128xbf16>, vector<128x512xbf16>, vector<16x512xf32> -> vector<16x512xf32>
    %c0_66 = arith.constant 0 : index
    %c0_67 = arith.constant 0 : index
    %c0_68 = arith.constant 0 : index
    %205 = vector.load %arg12[%c0_66, %c0_67, %c0_68] : memref<1x1x512xf32, #tpu.memory_space<vmem>>, vector<1x1x512xf32>
    %206 = vector.shape_cast %205 : vector<1x1x512xf32> to vector<1x512xf32>
    %207 = vector.broadcast %206 : vector<1x512xf32> to vector<16x512xf32>
    %208 = arith.addf %204, %207 : vector<16x512xf32>
    %cst_69 = arith.constant 5.000000e-01 : f32
    %209 = vector.broadcast %cst_69 : f32 to vector<16x512xf32>
    %210 = arith.mulf %209, %208 : vector<16x512xf32>
    %cst_70 = arith.constant 0.707106769 : f32
    %211 = vector.broadcast %cst_70 : f32 to vector<16x512xf32>
    %212 = arith.mulf %208, %211 : vector<16x512xf32>
    %cst_71 = arith.constant 0.000000e+00 : f32
    %213 = vector.broadcast %cst_71 : f32 to vector<16x512xf32>
    %214 = arith.cmpf oge, %212, %213 : vector<16x512xf32>
    %cst_72 = arith.constant 1.000000e+00 : f32
    %cst_73 = arith.constant -1.000000e+00 : f32
    %215 = vector.broadcast %cst_72 : f32 to vector<16x512xf32>
    %216 = vector.broadcast %cst_73 : f32 to vector<16x512xf32>
    %217 = arith.select %214, %215, %216 : vector<16x512xi1>, vector<16x512xf32>
    %218 = math.absf %212 : vector<16x512xf32>
    %cst_74 = arith.constant 0.327591091 : f32
    %219 = vector.broadcast %cst_74 : f32 to vector<16x512xf32>
    %220 = arith.mulf %219, %218 : vector<16x512xf32>
    %cst_75 = arith.constant 1.000000e+00 : f32
    %221 = vector.broadcast %cst_75 : f32 to vector<16x512xf32>
    %222 = arith.addf %221, %220 : vector<16x512xf32>
    %cst_76 = arith.constant 1.000000e+00 : f32
    %223 = vector.broadcast %cst_76 : f32 to vector<16x512xf32>
    %224 = arith.divf %223, %222 : vector<16x512xf32>
    %cst_77 = arith.constant 1.06140542 : f32
    %225 = vector.broadcast %cst_77 : f32 to vector<16x512xf32>
    %226 = arith.mulf %225, %224 : vector<16x512xf32>
    %cst_78 = arith.constant -1.45315206 : f32
    %227 = vector.broadcast %cst_78 : f32 to vector<16x512xf32>
    %228 = arith.addf %226, %227 : vector<16x512xf32>
    %229 = arith.mulf %228, %224 : vector<16x512xf32>
    %cst_79 = arith.constant 1.42141378 : f32
    %230 = vector.broadcast %cst_79 : f32 to vector<16x512xf32>
    %231 = arith.addf %229, %230 : vector<16x512xf32>
    %232 = arith.mulf %231, %224 : vector<16x512xf32>
    %cst_80 = arith.constant -0.284496725 : f32
    %233 = vector.broadcast %cst_80 : f32 to vector<16x512xf32>
    %234 = arith.addf %232, %233 : vector<16x512xf32>
    %235 = arith.mulf %234, %224 : vector<16x512xf32>
    %cst_81 = arith.constant 0.254829586 : f32
    %236 = vector.broadcast %cst_81 : f32 to vector<16x512xf32>
    %237 = arith.addf %235, %236 : vector<16x512xf32>
    %238 = arith.mulf %237, %224 : vector<16x512xf32>
    %cst_82 = arith.constant 0.000000e+00 : f32
    %239 = vector.broadcast %cst_82 : f32 to vector<16x512xf32>
    %240 = arith.subf %239, %218 : vector<16x512xf32>
    %241 = arith.mulf %240, %218 : vector<16x512xf32>
    %242 = math.exp %241 : vector<16x512xf32>
    %243 = arith.mulf %238, %242 : vector<16x512xf32>
    %cst_83 = arith.constant 1.000000e+00 : f32
    %244 = vector.broadcast %cst_83 : f32 to vector<16x512xf32>
    %245 = arith.subf %244, %243 : vector<16x512xf32>
    %246 = arith.mulf %217, %245 : vector<16x512xf32>
    %cst_84 = arith.constant 1.000000e+00 : f32
    %247 = vector.broadcast %cst_84 : f32 to vector<16x512xf32>
    %248 = arith.addf %247, %246 : vector<16x512xf32>
    %249 = arith.mulf %210, %248 : vector<16x512xf32>
    %250 = arith.truncf %249 : vector<16x512xf32> to vector<16x512xbf16>
    %c0_85 = arith.constant 0 : index
    %c0_86 = arith.constant 0 : index
    %c0_87 = arith.constant 0 : index
    %251 = vector.load %arg13[%c0_85, %c0_86, %c0_87] : memref<1x512x128xbf16, #tpu.memory_space<vmem>>, vector<1x512x128xbf16>
    %252 = vector.shape_cast %251 : vector<1x512x128xbf16> to vector<512x128xbf16>
    %cst_88 = arith.constant dense<0.000000e+00> : vector<16x128xf32>
    %253 = tpu.matmul %250, %252, %cst_88 {dimension_numbers = #tpu.dot_dimension_numbers<[1], [0], [0], [1], [0, 0, 1, 1], [], []>} : vector<16x512xbf16>, vector<512x128xbf16>, vector<16x128xf32> -> vector<16x128xf32>
    %c0_89 = arith.constant 0 : index
    %c0_90 = arith.constant 0 : index
    %c0_91 = arith.constant 0 : index
    %254 = vector.load %arg14[%c0_89, %c0_90, %c0_91] : memref<1x1x128xf32, #tpu.memory_space<vmem>>, vector<1x1x128xf32>
    %255 = vector.shape_cast %254 : vector<1x1x128xf32> to vector<1x128xf32>
    %256 = vector.broadcast %255 : vector<1x128xf32> to vector<16x128xf32>
    %257 = arith.addf %253, %256 : vector<16x128xf32>
    %258 = arith.addf %174, %257 : vector<16x128xf32>
    %259 = vector.shape_cast %258 : vector<16x128xf32> to vector<2x8x128xf32>
    %c0_92 = arith.constant 0 : index
    %c0_93 = arith.constant 0 : index
    %c0_94 = arith.constant 0 : index
    %260 = vector.load %arg16[%c0_92, %c0_93, %c0_94] : memref<2x8x128xf32, #tpu.memory_space<vmem>>, vector<2x8x128xf32>
    tpu.vector_store %arg16[%c0_92, %c0_93, %c0_94], %259 {strides = array<i32>} : memref<2x8x128xf32, #tpu.memory_space<vmem>>, vector<2x8x128xf32>,
    %c0_95 = arith.constant 0 : index
    %c0_96 = arith.constant 0 : index
    %c0_97 = arith.constant 0 : index
    %261 = vector.load %arg15[%c0_95, %c0_96, %c0_97] : memref<2x8x128xf32, #tpu.memory_space<vmem>>, vector<2x8x128xf32>
    tpu.vector_store %arg15[%c0_95, %c0_96, %c0_97], %259 {strides = array<i32>} : memref<2x8x128xf32, #tpu.memory_space<vmem>>, vector<2x8x128xf32>,
    return
  }
  func.func @transform_0(%arg0: i32, %arg1: i32) -> (i32, i32, i32) {
    %c0_i32 = arith.constant 0 : i32
    %c0_i32_0 = arith.constant 0 : i32
    %c0_i32_1 = arith.constant 0 : i32
    return %arg0, %c0_i32, %c0_i32_0 : i32, i32, i32
  }
  func.func @transform_1(%arg0: i32, %arg1: i32) -> (i32, i32, i32) {
    %c0_i32 = arith.constant 0 : i32
    %c0_i32_0 = arith.constant 0 : i32
    %c0_i32_1 = arith.constant 0 : i32
    return %arg1, %c0_i32, %c0_i32_0 : i32, i32, i32
  }
  func.func @transform_2(%arg0: i32, %arg1: i32) -> (i32, i32, i32) {
    %c0_i32 = arith.constant 0 : i32
    %c0_i32_0 = arith.constant 0 : i32
    %c0_i32_1 = arith.constant 0 : i32
    return %arg1, %c0_i32, %c0_i32_0 : i32, i32, i32
  }
  func.func @transform_3(%arg0: i32, %arg1: i32) -> (i32, i32, i32) {
    %c0_i32 = arith.constant 0 : i32
    %c0_i32_0 = arith.constant 0 : i32
    %c0_i32_1 = arith.constant 0 : i32
    return %arg1, %c0_i32, %c0_i32_0 : i32, i32, i32
  }
  func.func @transform_4(%arg0: i32, %arg1: i32) -> (i32, i32, i32) {
    %c0_i32 = arith.constant 0 : i32
    %c0_i32_0 = arith.constant 0 : i32
    %c0_i32_1 = arith.constant 0 : i32
    return %arg1, %c0_i32, %c0_i32_0 : i32, i32, i32
  }
  func.func @transform_5(%arg0: i32, %arg1: i32) -> (i32, i32, i32) {
    %c0_i32 = arith.constant 0 : i32
    %c0_i32_0 = arith.constant 0 : i32
    %c0_i32_1 = arith.constant 0 : i32
    return %arg1, %c0_i32, %c0_i32_0 : i32, i32, i32
  }
  func.func @transform_6(%arg0: i32, %arg1: i32) -> (i32, i32, i32) {
    %c0_i32 = arith.constant 0 : i32
    %c0_i32_0 = arith.constant 0 : i32
    %c0_i32_1 = arith.constant 0 : i32
    return %arg1, %c0_i32, %c0_i32_0 : i32, i32, i32
  }
  func.func @transform_7(%arg0: i32, %arg1: i32) -> (i32, i32, i32) {
    %c0_i32 = arith.constant 0 : i32
    %c0_i32_0 = arith.constant 0 : i32
    %c0_i32_1 = arith.constant 0 : i32
    return %arg1, %c0_i32, %c0_i32_0 : i32, i32, i32
  }
  func.func @transform_8(%arg0: i32, %arg1: i32) -> (i32, i32, i32) {
    %c0_i32 = arith.constant 0 : i32
    %c0_i32_0 = arith.constant 0 : i32
    %c0_i32_1 = arith.constant 0 : i32
    return %arg1, %c0_i32, %c0_i32_0 : i32, i32, i32
  }
  func.func @transform_9(%arg0: i32, %arg1: i32) -> (i32, i32, i32) {
    %c0_i32 = arith.constant 0 : i32
    %c0_i32_0 = arith.constant 0 : i32
    %c0_i32_1 = arith.constant 0 : i32
    return %arg1, %c0_i32, %c0_i32_0 : i32, i32, i32
  }
  func.func @transform_10(%arg0: i32, %arg1: i32) -> (i32, i32, i32) {
    %c0_i32 = arith.constant 0 : i32
    %c0_i32_0 = arith.constant 0 : i32
    %c0_i32_1 = arith.constant 0 : i32
    return %arg1, %c0_i32, %c0_i32_0 : i32, i32, i32
  }
  func.func @transform_11(%arg0: i32, %arg1: i32) -> (i32, i32, i32) {
    %c0_i32 = arith.constant 0 : i32
    %c0_i32_0 = arith.constant 0 : i32
    %c0_i32_1 = arith.constant 0 : i32
    return %arg1, %c0_i32, %c0_i32_0 : i32, i32, i32
  }
  func.func @transform_12(%arg0: i32, %arg1: i32) -> (i32, i32, i32) {
    %c0_i32 = arith.constant 0 : i32
    %c0_i32_0 = arith.constant 0 : i32
    %c0_i32_1 = arith.constant 0 : i32
    return %arg1, %c0_i32, %c0_i32_0 : i32, i32, i32
  }
  func.func @transform_13(%arg0: i32, %arg1: i32) -> (i32, i32, i32) {
    %c0_i32 = arith.constant 0 : i32
    %c0_i32_0 = arith.constant 0 : i32
    %c0_i32_1 = arith.constant 0 : i32
    return %arg0, %c0_i32, %c0_i32_0 : i32, i32, i32
  }
}

module attributes {stable_mosaic.version = 11 : i64} {
  func.func @_lnf_lm_head_kernel(%arg0: i32, %arg1: i32, %arg2: memref<16x128xf32, #tpu.memory_space<vmem>>, %arg3: memref<1x128xf32, #tpu.memory_space<vmem>>, %arg4: memref<1x128xf32, #tpu.memory_space<vmem>>, %arg5: memref<128x512xbf16, #tpu.memory_space<vmem>>, %arg6: memref<16x512xf32, #tpu.memory_space<vmem>>) attributes {dimension_semantics = [#tpu.dimension_semantics<parallel>, #tpu.dimension_semantics<parallel>], iteration_bounds = array<i64: 1, 1>, scalar_prefetch = 0 : i64, scratch_operands = 0 : i64, tpu.core_type = #tpu.core_type<tc>, window_params = [{transform_indices = @transform_0, window_bounds = array<i64: 16, 128>}, {pipeline_mode = #tpu.pipeline_mode<synchronous>, transform_indices = @transform_1, window_bounds = array<i64: 1, 128>}, {pipeline_mode = #tpu.pipeline_mode<synchronous>, transform_indices = @transform_2, window_bounds = array<i64: 1, 128>}, {transform_indices = @transform_3, window_bounds = array<i64: 128, 512>}, {transform_indices = @transform_4, window_bounds = array<i64: 16, 512>}]} {
    %c0 = arith.constant 0 : index
    %c0_0 = arith.constant 0 : index
    %0 = vector.load %arg2[%c0, %c0_0] : memref<16x128xf32, #tpu.memory_space<vmem>>, vector<16x128xf32>
    %c0_1 = arith.constant 0 : index
    %c0_2 = arith.constant 0 : index
    %1 = vector.load %arg3[%c0_1, %c0_2] : memref<1x128xf32, #tpu.memory_space<vmem>>, vector<1x128xf32>
    %c0_3 = arith.constant 0 : index
    %c0_4 = arith.constant 0 : index
    %2 = vector.load %arg4[%c0_3, %c0_4] : memref<1x128xf32, #tpu.memory_space<vmem>>, vector<1x128xf32>
    %cst = arith.constant dense<0.000000e+00> : vector<16xf32>
    %3 = vector.multi_reduction <add>, %0, %cst [1] : vector<16x128xf32> to vector<16xf32>
    %4 = vector.shape_cast %3 : vector<16xf32> to vector<16x1xf32>
    %cst_5 = arith.constant 1.280000e+02 : f32
    %5 = vector.broadcast %cst_5 : f32 to vector<16x1xf32>
    %6 = arith.divf %4, %5 : vector<16x1xf32>
    %7 = vector.broadcast %6 : vector<16x1xf32> to vector<16x128xf32>
    %8 = arith.subf %0, %7 : vector<16x128xf32>
    %9 = arith.mulf %8, %8 : vector<16x128xf32>
    %cst_6 = arith.constant dense<0.000000e+00> : vector<16xf32>
    %10 = vector.multi_reduction <add>, %9, %cst_6 [1] : vector<16x128xf32> to vector<16xf32>
    %11 = vector.shape_cast %10 : vector<16xf32> to vector<16x1xf32>
    %cst_7 = arith.constant 1.280000e+02 : f32
    %12 = vector.broadcast %cst_7 : f32 to vector<16x1xf32>
    %13 = arith.divf %11, %12 : vector<16x1xf32>
    %14 = vector.broadcast %6 : vector<16x1xf32> to vector<16x128xf32>
    %15 = arith.subf %0, %14 : vector<16x128xf32>
    %cst_8 = arith.constant 9.99999974E-6 : f32
    %16 = vector.broadcast %cst_8 : f32 to vector<16x1xf32>
    %17 = arith.addf %13, %16 : vector<16x1xf32>
    %18 = math.rsqrt %17 : vector<16x1xf32>
    %19 = vector.broadcast %18 : vector<16x1xf32> to vector<16x128xf32>
    %20 = arith.mulf %15, %19 : vector<16x128xf32>
    %21 = vector.broadcast %1 : vector<1x128xf32> to vector<16x128xf32>
    %22 = arith.mulf %20, %21 : vector<16x128xf32>
    %23 = vector.broadcast %2 : vector<1x128xf32> to vector<16x128xf32>
    %24 = arith.addf %22, %23 : vector<16x128xf32>
    %25 = arith.truncf %24 : vector<16x128xf32> to vector<16x128xbf16>
    %c0_9 = arith.constant 0 : index
    %c0_10 = arith.constant 0 : index
    %26 = vector.load %arg5[%c0_9, %c0_10] : memref<128x512xbf16, #tpu.memory_space<vmem>>, vector<128x512xbf16>
    %cst_11 = arith.constant dense<0.000000e+00> : vector<16x512xf32>
    %27 = tpu.matmul %25, %26, %cst_11 {dimension_numbers = #tpu.dot_dimension_numbers<[1], [0], [0], [1], [0, 0, 1, 1], [], []>} : vector<16x128xbf16>, vector<128x512xbf16>, vector<16x512xf32> -> vector<16x512xf32>
    %c0_12 = arith.constant 0 : index
    %c0_13 = arith.constant 0 : index
    %28 = vector.load %arg6[%c0_12, %c0_13] : memref<16x512xf32, #tpu.memory_space<vmem>>, vector<16x512xf32>
    tpu.vector_store %arg6[%c0_12, %c0_13], %27 {strides = array<i32>} : memref<16x512xf32, #tpu.memory_space<vmem>>, vector<16x512xf32>,
    return
  }
  func.func @transform_0(%arg0: i32, %arg1: i32) -> (i32, i32) {
    %c0_i32 = arith.constant 0 : i32
    %c0_i32_0 = arith.constant 0 : i32
    return %arg0, %c0_i32 : i32, i32
  }
  func.func @transform_1(%arg0: i32, %arg1: i32) -> (i32, i32) {
    %c0_i32 = arith.constant 0 : i32
    %c0_i32_0 = arith.constant 0 : i32
    %c0_i32_1 = arith.constant 0 : i32
    return %c0_i32, %c0_i32_0 : i32, i32
  }
  func.func @transform_2(%arg0: i32, %arg1: i32) -> (i32, i32) {
    %c0_i32 = arith.constant 0 : i32
    %c0_i32_0 = arith.constant 0 : i32
    %c0_i32_1 = arith.constant 0 : i32
    return %c0_i32, %c0_i32_0 : i32, i32
  }
  func.func @transform_3(%arg0: i32, %arg1: i32) -> (i32, i32) {
    %c0_i32 = arith.constant 0 : i32
    %c0_i32_0 = arith.constant 0 : i32
    return %c0_i32, %arg1 : i32, i32
  }
  func.func @transform_4(%arg0: i32, %arg1: i32) -> (i32, i32) {
    %c0_i32 = arith.constant 0 : i32
    return %arg0, %arg1 : i32, i32
  }
}

</mosaic_0001>

<bundles_post_ra>
// kernel: gpt2_forward.3
= control target key start
LH: loop header
LB: loop body
LE: loop exit
PB: predicated region body
PF: predicated region fallthrough
CT: control target
= control target key end

     0   :  { %s638_s0 = inlined_call_operand.vmem [shape: f32[16,128], index: 0, kind: input, shape index: {}]   ;;  %s639_s1 = inlined_call_operand.vmem [shape: f32[1,128], index: 1, kind: input, shape index: {}]   ;;  %s640_s2 = inlined_call_operand.vmem [shape: f32[1,128], index: 2, kind: input, shape index: {}]   ;;  %s641_s3 = inlined_call_operand.vmem [shape: bf16[128,512], index: 3, kind: input, shape index: {}]   ;;  %s642_s4 = inlined_call_operand.hbm [shape: f32[16,512], index: 4, kind: output, shape index: {}]  }
   0x1   :  { %v19_v0 = vld [vmem:[%s638_s0] sm:$0xff]  ;;  %v20_v1 = vld [vmem:[%s638_s0 + $0x8] sm:$0xff] }
   0x2   :  { %23 = vadd.xlane.f32.xlu0 %v19_v0 }
   0x6   :  { %25 = vadd.xlane.f32.xlu0 %v20_v1 }
   0x7   :  { %9 = vsyncpa [#allocation3], 0  ;;  %v403_v2 = vld [vmem:[%s641_s3 + $0x4] ss:$16 sps:$4 sm:$0xff]   ;;  %v405_v3 = vld [vmem:[%s641_s3 + $0xc] ss:$16 sps:$4 sm:$0xff]  }
   0x8   :  { %v407_v4 = vld [vmem:[%s641_s3] ss:$16 sps:$4 sm:$0xff]   ;;  %v408_v5 = vld [vmem:[%s641_s3 + $0x8] ss:$16 sps:$4 sm:$0xff]   ;;  %v409_v6 = vld [vmem:[%s641_s3 + $0x24] ss:$16 sps:$4 sm:$0xff]   ;;  %255 = vmatprep.subr.bf16.mxu0 %v403_v2  ;;  %298 = vmatprep.subr.bf16.mxu1 %v405_v3 }
   0x9   :  { %v411_v7 = vld [vmem:[%s641_s3 + $0x2c] ss:$16 sps:$4 sm:$0xff]   ;;  %256 = vmatpush1.bf16.msra.mxu0 %v407_v4  ;;  %299 = vmatpush1.bf16.msra.mxu1 %v408_v5  ;;  %v413_v16 = vld [vmem:[%s641_s3 + $0x20] ss:$16 sps:$4 sm:$0xff]   ;;  %v414_v17 = vld [vmem:[%s641_s3 + $0x28] ss:$16 sps:$4 sm:$0xff]  }
   0xa   :  { %257 = vmatprep.subr.bf16.mxu0 %v409_v6  ;;  %300 = vmatprep.subr.bf16.mxu1 %v411_v7  ;;  %v415_v18 = vld [vmem:[%s641_s3 + $0x44] ss:$16 sps:$4 sm:$0xff]   ;;  %v417_v19 = vld [vmem:[%s641_s3 + $0x4c] ss:$16 sps:$4 sm:$0xff]   ;;  %v419_v20 = vld [vmem:[%s641_s3 + $0x40] ss:$16 sps:$4 sm:$0xff]  }
   0xb   :  { %v420_v21 = vld [vmem:[%s641_s3 + $0x48] ss:$16 sps:$4 sm:$0xff]   ;;  %v421_v22 = vld [vmem:[%s641_s3 + $0x64] ss:$16 sps:$4 sm:$0xff]   ;;  %v423_v23 = vld [vmem:[%s641_s3 + $0x6c] ss:$16 sps:$4 sm:$0xff]  }
   0xc   :  { %v425_v24 = vld [vmem:[%s641_s3 + $0x60] ss:$16 sps:$4 sm:$0xff]   ;;  %v426_v25 = vld [vmem:[%s641_s3 + $0x68] ss:$16 sps:$4 sm:$0xff]   ;;  %v427_v26 = vld [vmem:[%s641_s3 + $0x84] ss:$16 sps:$4 sm:$0xff]  }
   0xd   :  { %258 = vmatpush1.bf16.msra.mxu0 %v413_v16  ;;  %301 = vmatpush1.bf16.msra.mxu1 %v414_v17  ;;  %v429_v27 = vld [vmem:[%s641_s3 + $0x8c] ss:$16 sps:$4 sm:$0xff]   ;;  %v431_v28 = vld [vmem:[%s641_s3 + $0x80] ss:$16 sps:$4 sm:$0xff]   ;;  %v432_v29 = vld [vmem:[%s641_s3 + $0x88] ss:$16 sps:$4 sm:$0xff]  }
   0xe   :  { %259 = vmatprep.subr.bf16.mxu0 %v415_v18  ;;  %302 = vmatprep.subr.bf16.mxu1 %v417_v19  ;;  %v433_v30 = vld [vmem:[%s641_s3 + $0xa4] ss:$16 sps:$4 sm:$0xff]   ;;  %v435_v31 = vld [vmem:[%s641_s3 + $0xac] ss:$16 sps:$4 sm:$0xff]   ;;  %v437_v32 = vld [vmem:[%s641_s3 + $0xa0] ss:$16 sps:$4 sm:$0xff]  }
   0xf   :  { %v438_v33 = vld [vmem:[%s641_s3 + $0xa8] ss:$16 sps:$4 sm:$0xff]   ;;  %v439_v34 = vld [vmem:[%s641_s3 + $0xc4] ss:$16 sps:$4 sm:$0xff]   ;;  %v441_v35 = vld [vmem:[%s641_s3 + $0xcc] ss:$16 sps:$4 sm:$0xff]  }
  0x10   :  { %v479_v36 = vmov 0   ;;  %v443_v37 = vld [vmem:[%s641_s3 + $0xc0] ss:$16 sps:$4 sm:$0xff]   ;;  %v444_v38 = vld [vmem:[%s641_s3 + $0xc8] ss:$16 sps:$4 sm:$0xff]   ;;  %s480_s5 = smov [#allocation2]  }
  0x11   :  { %260 = vmatpush1.bf16.msra.mxu0 %v419_v20  ;;  %303 = vmatpush1.bf16.msra.mxu1 %v420_v21  ;;  %v445_v39 = vld [vmem:[%s641_s3 + $0xe4] ss:$16 sps:$4 sm:$0xff]   ;;  %v447_v40 = vld [vmem:[%s641_s3 + $0xec] ss:$16 sps:$4 sm:$0xff]   ;;  %v449_v41 = vld [vmem:[%s641_s3 + $0xe0] ss:$16 sps:$4 sm:$0xff]  }
  0x12   :  { %261 = vmatprep.subr.bf16.mxu0 %v421_v22  ;;  %304 = vmatprep.subr.bf16.mxu1 %v423_v23  ;;  %v450_v42 = vld [vmem:[%s641_s3 + $0xe8] ss:$16 sps:$4 sm:$0xff]   ;;  %v365_v51 = vld [vmem:[%s639_s1] ss:$0 sm:$0xff]  ;;  %s354_s6 = sshll.u32 %s480_s5, 4  ;;  %s355_s6 = int_to_ptr.vmem [resolvable:$true] %s354_s6 }
  0x13   :  { %287 = vmatprep.mubr.bf16.mxu0 %v479_v36  ;;  %330 = vmatprep.mubr.bf16.mxu1 %v479_v36  ;;  %v366_v55 = vld [vmem:[%s640_s2] ss:$0 sm:$0xff]  ;;  %s455_s1 = scalar_lea.vmem %s355_s6, 1024  ;;  %p460_p1 = scmp.lt.s32.totalorder %s355_s6, %s355_s6 }
  0x14   :  { %p456_p0 = scmp.ne.s32.totalorder %s355_s6, %s455_s1  ;;  %p461_p2 = scmp.lt.s32.totalorder %s455_s1, %s455_s1 }
  0x15   :  { %262 = vmatpush1.bf16.msra.mxu0 %v425_v24  ;;  %305 = vmatpush1.bf16.msra.mxu1 %v426_v25 }
  0x16   :  { %263 = vmatprep.subr.bf16.mxu0 %v427_v26  ;;  %306 = vmatprep.subr.bf16.mxu1 %v429_v27  ;;  %p462_p3 = por %p461_p2, %p460_p1 }
  0x18   :  { %p463_p4 = pnand %p462_p3, %p456_p0 }
  0x19   :  { %264 = vmatpush1.bf16.msra.mxu0 %v431_v28  ;;  %307 = vmatpush1.bf16.msra.mxu1 %v432_v29 }
  0x1a   :  { %265 = vmatprep.subr.bf16.mxu0 %v433_v30  ;;  %308 = vmatprep.subr.bf16.mxu1 %v435_v31 }
  0x1d   :  { %266 = vmatpush1.bf16.msra.mxu0 %v437_v32  ;;  %309 = vmatpush1.bf16.msra.mxu1 %v438_v33 }
  0x1e   :  { %267 = vmatprep.subr.bf16.mxu0 %v439_v34  ;;  %310 = vmatprep.subr.bf16.mxu1 %v441_v35 }
  0x21   :  { %268 = vmatpush1.bf16.msra.mxu0 %v443_v37  ;;  %311 = vmatpush1.bf16.msra.mxu1 %v444_v38 }
  0x22   :  { %269 = vmatprep.subr.bf16.mxu0 %v445_v39  ;;  %312 = vmatprep.subr.bf16.mxu1 %v447_v40 }
  0x25   :  { %270 = vmatpush1.bf16.msra.mxu0 %v449_v41  ;;  %313 = vmatpush1.bf16.msra.mxu1 %v450_v42 }
  0x8f   :  { %v24_v8 = vpop.xlane.xlu0 %23 }
  0x90   :  { %v28_v9 = vmul.f32 0.0078125, %v24_v8 }
  0x92   :  { %v532_v10 = vsub.f32 %v19_v0, %v28_v9 }
  0x93   :  { %v26_v11 = vpop.xlane.xlu0 %25 }
  0x94   :  { %v29_v12 = vmul.f32 0.0078125, %v26_v11  ;;  %v32_v13 = vmul.f32 %v532_v10, %v532_v10 }
  0x96   :  { %v536_v14 = vsub.f32 %v20_v1, %v29_v12  ;;  %34 = vadd.xlane.f32.xlu1 %v32_v13 }
  0x98   :  { %v33_v15 = vmul.f32 %v536_v14, %v536_v14 }
  0x9a   :  { %36 = vadd.xlane.f32.xlu1 %v33_v15 }
 0x123   :  { %v35_v43 = vpop.xlane.xlu1 %34 }
 0x124   :  { %v38_v44 = vmul.f32 0.0078125, %v35_v43 }
 0x126   :  { %v40_v45 = vadd.f32 1e-05, %v38_v44 }
 0x127   :  { %v37_v46 = vpop.xlane.xlu1 %36 }
 0x128   :  { %451 = vrsqrt.f32 %v40_v45  ;;  %v39_v47 = vmul.f32 0.0078125, %v37_v46 }
 0x12a   :  { %v41_v48 = vadd.f32 1e-05, %v39_v47 }
 0x12c   :  { %453 = vrsqrt.f32 %v41_v48 }
 0x132   :  { %v452_v49 = vpop.eup %451 }
 0x133   :  { %v44_v50 = vmul.f32 %v452_v49, %v532_v10 }
 0x135   :  { %v52_v54 = vmul.f32 %v365_v51, %v44_v50 }
 0x136   :  { %v454_v52 = vpop.eup %453 }
 0x137   :  { %v45_v53 = vmul.f32 %v454_v52, %v536_v14  ;;  %v60_v57 = vadd.f32 %v366_v55, %v52_v54 }
 0x139   :  { %v53_v56 = vmul.f32 %v365_v51, %v45_v53 }
 0x13b   :  { %v61_v58 = vadd.f32 %v366_v55, %v53_v56 }
 0x13d   :  { %v62_v59 = vpack.c.bf16 %v61_v58, %v60_v57 }
 0x13f   :  { %288 = vmatmul.mubr.bf16.vlgmr.msra.gmra.mrb[0].mxu0 %v62_v59  ;;  %331 = vmatmul.mubr.bf16.vlgmr.msra.gmra.mrb[0].mxu1 %v62_v59 }
 0x212   :  { %v289_v60 = vpop.f32.mrb[0].mxu0  ;;  %v332_v61 = vpop.f32.mrb[0].mxu1 }
 0x213   :  { %341 = vst [vmem:[#allocation2] sm:$0xff] %v289_v60  ;;  %343 = vst [vmem:[#allocation2 + $0x10] sm:$0xff] %v332_v61  ;;  %v291_v62 = vpop.f32.mrb[1].mxu0  ;;  %v334_v63 = vpop.f32.mrb[1].mxu1 }
 0x214   :  { %342 = vst [vmem:[#allocation2 + $0x8] sm:$0xff] %v291_v62  ;;  %344 = vst [vmem:[#allocation2 + $0x18] sm:$0xff] %v334_v63  ;;  %v293_v0 = vpop.f32.mrb[2].mxu0  ;;  %v336_v1 = vpop.f32.mrb[2].mxu1 }
 0x215   :  { %345 = vst [vmem:[#allocation2 + $0x20] sm:$0xff] %v293_v0  ;;  %347 = vst [vmem:[#allocation2 + $0x30] sm:$0xff] %v336_v1  ;;  %v295_v2 = vpop.f32.mrb[3].mxu0  ;;  %v338_v3 = vpop.f32.mrb[3].mxu1 }
 0x216   :  { %346 = vst [vmem:[#allocation2 + $0x28] sm:$0xff] %v295_v2  ;;  %348 = vst [vmem:[#allocation2 + $0x38] sm:$0xff] %v338_v3 }
 0x217   :  { %466 = shalt.err (!%p463_p4)
}
 0x218   :  { %s467_s8 = scalar_lea.hbm %s642_s4, 1024 }
 0x219   :  { %p468_p5 = scmp.ne.s32.totalorder %s642_s4, %s467_s8  ;;  %p471_p6 = scmp.lt.u32.totalorder %s467_s8, %s642_s4 }
 0x21b   :  { %p473_p7 = pnand %p471_p6, %p468_p5 }
 0x21d   :  { %476 = shalt.err (!%p473_p7)
}
 0x21e   :  { %s481_s13 = smov 512   ;;  %s482_s14 = smov 32  }
 0x21f   :  { %360 = dma.vmem_to_hbm [thread:$0]  %s355_s6, 1024, %s642_s4, [#allocation3], %s481_s13, %s481_s13, %s482_s14  }
 0x220   :  { %477 = dma.done.wait [#allocation3], 1024  }
 0x221   :  { %478 = vsyncadd [#allocation3], 4294966272 }
 0x222   :  { %364 = vsyncpa [#allocation3], 1 }

// kernel: gpt2_forward.2
= control target key start
LH: loop header
LB: loop body
LE: loop exit
PB: predicated region body
PF: predicated region fallthrough
CT: control target
= control target key end

     0   :  { %s5020_s0 = inlined_call_operand.vmem [shape: f32[2,8,128], index: 0, kind: input, shape index: {}]   ;;  %s5021_s1 = inlined_call_operand.vmem [shape: f32[2,1,128], index: 1, kind: input, shape index: {}]   ;;  %s5022_s2 = inlined_call_operand.vmem [shape: f32[2,1,128], index: 2, kind: input, shape index: {}]   ;;  %s5023_s3 = inlined_call_operand.hbm [shape: bf16[2,128,384], index: 3, kind: input, shape index: {}]   ;;  %s5024_s4 = inlined_call_operand.vmem [shape: f32[2,1,384], index: 4, kind: input, shape index: {}]   ;;  %s5025_s5 = inlined_call_operand.vmem [shape: bf16[2,128,128], index: 5, kind: input, shape index: {}]   ;;  %s5026_s6 = inlined_call_operand.vmem [shape: f32[2,1,128], index: 6, kind: input, shape index: {}]   ;;  %s5027_s7 = inlined_call_operand.vmem [shape: f32[2,1,128], index: 7, kind: input, shape index: {}]   ;;  %s5028_s8 = inlined_call_operand.vmem [shape: f32[2,1,128], index: 8, kind: input, shape index: {}]   ;;  %s5029_s9 = inlined_call_operand.hbm [shape: bf16[2,128,512], index: 9, kind: input, shape index: {}]   ;;  %s5030_s10 = inlined_call_operand.vmem [shape: f32[2,1,512], index: 10, kind: input, shape index: {}]   ;;  %s5031_s11 = inlined_call_operand.hbm [shape: bf16[2,512,128], index: 11, kind: input, shape index: {}]   ;;  %s5032_s12 = inlined_call_operand.vmem [shape: f32[2,1,128], index: 12, kind: input, shape index: {}]   ;;  %s5033_s13 = inlined_call_operand.vmem [shape: f32[2,8,128], index: 13, kind: output, shape index: {}]  }
   0x1   :  { %5044 = sst [smem:[#allocation15_spill]] %s5020_s0 }
   0x2   :  { %5045 = sst [smem:[#allocation16_spill]] %s5023_s3 }
   0x3   :  { %5046 = sst [smem:[#allocation17_spill]] %s5025_s5 }
   0x4   :  { %5047 = sst [smem:[#allocation18_spill]] %s5029_s9 }
   0x5   :  { %5048 = sst [smem:[#allocation19_spill]] %s5030_s10 }
   0x6   :  { %5049 = sst [smem:[#allocation20_spill]] %s5031_s11 }
   0x7   :  { %5050 = sst [smem:[#allocation21_spill]] %s5032_s12 }
   0x8   :  { %5051 = sst [smem:[#allocation22_spill]] %s5033_s13 }
   0x9   :  { %18 = vsyncpa [#allocation4], 0 }
   0xa   :  { %20 = vsyncpa [#allocation4 + $0x1], 0 }
   0xb   :  { %21 = vsyncpa [#allocation6], 0 }
   0xc   :  { %23 = vsyncpa [#allocation6 + $0x1], 0  ;;  %s4215_s25 = smov 0   ;;  %s4217_s26 = smov 0  }
   0xd   :  { %s4219_s27 = smov 0   ;;  %s4221_s28 = smov 0  }
   0xe   :  { %s4223_s29 = smov 0   ;;  %s4225_s30 = smov 0  }
   0xf LB: > { %5052 = sst [smem:[#allocation10_spill]] %s4111_s26  ;;  %s5034_s14 = sadd.s32 4294967295, %s4127_s30   ;;  %s4127_s30 = sphi %s4225_s30, %s29_s30   ;;  %s4123_s29 = sphi %s4223_s29, %s5084_s29   ;;  %s4119_s28 = sphi %s4221_s28, %s5083_s28   ;;  %s4115_s27 = sphi %s4219_s27, %s5082_s27   ;;  %s4111_s26 = sphi %s4217_s26, %s5081_s26   ;;  %s4107_s25 = sphi %s4215_s25, %s5080_s25  }
  0x10   : > { %5053 = sst [smem:[#allocation11_spill]] %s4115_s27  ;;  %s38_s15 = sadd.s32 1, %s4123_s29 }
  0x11   : > { %5054 = sst [smem:[#allocation12_spill]] %s4123_s29  ;;  %p39_p0 = scmp.ge.s32.totalorder %s38_s15, 2 }
  0x12   : > { %s126_s16 = sadd.s32 1, %s4115_s27  ;;  %p133_p1 = scmp.ne.s32.totalorder %s4115_s27, %s4111_s26 }
  0x13   : > { %p134_p2 = scmp.eq.s32.totalorder %s4127_s30, 0  ;;  %s5086_s15 = smov (%p39_p0, %s38_s15), 0 }
  0x14   : > { %5055 = sst [smem:[#allocation13_spill]] %s5086_s15  ;;  %p139_p4 = scmp.ne.s32.totalorder %s4111_s26, %s4107_s25 }
  0x15   : > { %p135_p3 = por %p134_p2, %p133_p1  ;;  %s123_s17 = ssub.s32 %s4123_s29, %s5086_s15 }
  0x16   : > { %p140_p5 = scmp.eq.s32.totalorder %s5034_s14, 0  ;;  %p124_p6 = scmp.eq.s32.totalorder %s123_s17, 0 }
  0x17   : > { %p3727_p8 = scmp.lt.s32.totalorder %s4127_s30, 2  ;;  %s4265_s20 = sand.u32 1, %s4115_s27  }
  0x18   : > { %p4256_p7 = por %p140_p5, %p139_p4  ;;  %s498_s22 = sand.u32 1, %s4127_s30  }
  0x19   : > { %s4262_s19 = scalar_select %p124_p6, %s4115_s27, %s126_s16  }
  0x1a   : > { %s5056_s18 = scalar_select %p4256_p7, 1, 0 }
  0x1b   : > { %5057 = sst [smem:[#allocation14_spill]] %s4262_s19  ;;  %p4267_p9 = pnand %p3727_p8, %p135_p3 }
  0x1c   : > { %s5038_s23 = sshll.u32 %s4265_s20, 8  ;;  %s5039_s24 = sshll.u32 %s4123_s29, 12 }
  0x1d   : > { %s5059_s9 = sld [smem:[#allocation18_spill]]  ;;  %s502_s16 = scalar_lea.vmem [#allocation5], %s5038_s23 }
  0x1e   : > { %s509_s15 = sshll.u32 %s502_s16, 4  ;;  %s4285_s19 = scalar_lea.sflag [#allocation6], %s498_s22  ;;  %s4283_s15 = int_to_ptr.vmem [resolvable:$true] %s509_s15 }
  0x1f   : > { %p4291_p11 = pneg %p4267_p9 }
  0x23   : > { %s4279_s14 = scalar_lea.hbm %s5059_s9, %s5039_s24  ;;  %s3988_s23 = scalar_lea.hbm %s5059_s9, 8192 }
  0x24   : > { %s3983_s27 = scalar_lea.hbm %s4279_s14, 4096  ;;  %p3989_p0 = scmp.lt.u32.totalorder %s4279_s14, %s5059_s9 }
  0x25   : > { %p3984_p10 = scmp.ne.s32.totalorder %s4279_s14, %s3983_s27  ;;  %p3990_p1 = scmp.lt.u32.totalorder %s3988_s23, %s3983_s27 }
  0x26   : > { %p3992_p3 = scmp.lt.u32.totalorder %s3983_s27, %s4279_s14 }
  0x27   : > { %p3986_p12 = pnand %p4291_p11, %p3984_p10  ;;  %p3991_p2 = por %p3990_p1, %p3989_p0 }
  0x29   : > { %p3987_p13 = pneg %p3986_p12  ;;  %p3993_p4 = por %p3992_p3, %p3991_p2 }
  0x2b   : > { %p3994_p5 = pnand %p3993_p4, %p3987_p13 }
  0x2d   : > { %3997 = shalt.err (!%p3994_p5)
}
  0x2e   : > { %s3998_s22 = scalar_lea.vmem %s4283_s15, 4096  ;;  %s4129_s25 = smov [#allocation5]  }
  0x2f   : > { %p3999_p6 = scmp.ne.s32.totalorder %s4283_s15, %s3998_s22  ;;  %s4003_s17 = sshll.u32 %s4129_s25, 4  ;;  %s4004_s17 = int_to_ptr.vmem [resolvable:$false] %s4003_s17 }
  0x30   : > { %s4005_s24 = scalar_lea.vmem %s4004_s17, 8192  ;;  %p4006_p12 = scmp.lt.s32.totalorder %s4283_s15, %s4004_s17 }
  0x31   : > { %p4001_p8 = pnand %p3999_p6, %p4291_p11  ;;  %p4007_p7 = scmp.lt.s32.totalorder %s4005_s24, %s3998_s22 }
  0x33   : > { %p4002_p10 = pneg %p4001_p8  ;;  %p4008_p0 = por %p4007_p7, %p4006_p12 }
  0x35   : > { %p4009_p1 = pnand %p4008_p0, %p4002_p10 }
  0x37   : > { %4012 = shalt.err (!%p4009_p1)
}
  0x38   : > { %s4130_s27 = smov 256   ;;  %s4131_s23 = smov 16  }
  0x39   : > { %3723 = dma.hbm_to_vmem [thread:$0]  (!%p4267_p9), %s4279_s14, 4096, %s4283_s15, %s4285_s19, %s4130_s27, %s4130_s27, %s4131_s23  }
  0x3a   : > { %s5061_s16 = sshll.u32 %s4123_s29, 12  ;;  %s5062_s11 = sld [smem:[#allocation20_spill]] }
  0x3b   : > { %s5063_s24 = sshll.u32 %s4265_s20, 8  ;;  %p3326_p7 = scmp.ge.s32.totalorder %s4127_s30, 1 }
  0x3c   : > { %s530_s9 = scalar_lea.vmem [#allocation7], %s5063_s24  ;;  %p551_p13 = scmp.lt.s32.totalorder %s4127_s30, 3 }
  0x3d   : > { %s537_s0 = sshll.u32 %s530_s9, 4  ;;  %s3707_s10 = smul.u32 192, %s4265_s20  ;;  %s4324_s0 = int_to_ptr.vmem [resolvable:$true] %s537_s0 }
  0x3e   : > { %p4328_p2 = pnand %p3326_p7, %p551_p13  ;;  %s3708_s14 = smul.u32 3072, %s4123_s29 }
  0x3f   : > { %s5065_s3 = sld [smem:[#allocation16_spill]]  ;;  %s448_s9 = scalar_lea.vmem [#allocation3], %s3707_s10 }
  0x40   : > { %s4320_s17 = scalar_lea.hbm %s5062_s11, %s5061_s16  ;;  %s455_s16 = sshll.u32 %s448_s9, 4  ;;  %s4339_s16 = int_to_ptr.vmem [resolvable:$true] %s455_s16 }
  0x41   : > { %s5064_s12 = scalar_select %p4328_p2, 1, 0 }
  0x42   : > { %s445_s22 = scalar_lea.sflag [#allocation4], %s4265_s20 }
  0x45   : > { %s4337_s23 = scalar_lea.hbm %s5065_s3, %s3708_s14  ;;  %s4018_s15 = scalar_lea.hbm %s5065_s3, 6144 }
  0x46   : > { %s4013_s25 = scalar_lea.hbm %s4337_s23, 3072  ;;  %p4019_p6 = scmp.lt.u32.totalorder %s4337_s23, %s5065_s3 }
  0x47   : > { %p4014_p3 = scmp.ne.s32.totalorder %s4337_s23, %s4013_s25  ;;  %p4020_p8 = scmp.lt.u32.totalorder %s4018_s15, %s4013_s25 }
  0x48   : > { %p4022_p12 = scmp.lt.u32.totalorder %s4013_s25, %s4337_s23 }
  0x49   : > { %p4016_p4 = pnand %p4014_p3, %p4291_p11  ;;  %p4021_p10 = por %p4020_p8, %p4019_p6 }
  0x4b   : > { %p4017_p5 = pneg %p4016_p4  ;;  %p4023_p0 = por %p4022_p12, %p4021_p10 }
  0x4d   : > { %p4024_p1 = pnand %p4023_p0, %p4017_p5 }
  0x4f   : > { %4027 = shalt.err (!%p4024_p1)
}
  0x50   : > { %s4028_s10 = scalar_lea.vmem %s4339_s16, 3072  ;;  %s4132_s29 = smov [#allocation3]  }
  0x51   : > { %p4029_p7 = scmp.ne.s32.totalorder %s4339_s16, %s4028_s10  ;;  %s4033_s9 = sshll.u32 %s4132_s29, 4  ;;  %s4034_s9 = int_to_ptr.vmem [resolvable:$false] %s4033_s9 }
  0x52   : > { %s4035_s24 = scalar_lea.vmem %s4034_s9, 6144  ;;  %p4036_p4 = scmp.lt.s32.totalorder %s4339_s16, %s4034_s9 }
  0x53   : > { %p4031_p13 = pnand %p4029_p7, %p4291_p11  ;;  %p4037_p2 = scmp.lt.s32.totalorder %s4035_s24, %s4028_s10 }
  0x55   : > { %p4032_p3 = pneg %p4031_p13  ;;  %p4038_p6 = por %p4037_p2, %p4036_p4 }
  0x57   : > { %p4039_p8 = pnand %p4038_p6, %p4032_p3 }
  0x59   : > { %4042 = shalt.err (!%p4039_p8)
}
  0x5a   : > { %s4133_s25 = smov 192   ;;  %s4134_s15 = smov 12  }
  0x5b   : > { %3720 = dma.hbm_to_vmem [thread:$0]  (!%p4267_p9), %s4337_s23, 3072, %s4339_s16, %s445_s22, %s4133_s25, %s4133_s25, %s4134_s15  }
  0x5c   : > { %s4043_s14 = scalar_lea.hbm %s4320_s17, 4096  ;;  %s4048_s29 = scalar_lea.hbm %s5062_s11, 8192 }
  0x5d   : > { %p4044_p5 = scmp.ne.s32.totalorder %s4320_s17, %s4043_s14  ;;  %p4049_p12 = scmp.lt.u32.totalorder %s4320_s17, %s5062_s11 }
  0x5e   : > { %p4050_p0 = scmp.lt.u32.totalorder %s4048_s29, %s4043_s14  ;;  %p4052_p7 = scmp.lt.u32.totalorder %s4043_s14, %s4320_s17 }
  0x5f   : > { %p4046_p2 = pnand %p4044_p5, %p4291_p11 }
  0x60   : > { %p4051_p1 = por %p4050_p0, %p4049_p12 }
  0x61   : > { %p4047_p10 = pneg %p4046_p2 }
  0x62   : > { %p4053_p13 = por %p4052_p7, %p4051_p1 }
  0x64   : > { %p4054_p3 = pnand %p4053_p13, %p4047_p10 }
  0x66   : > { %4057 = shalt.err (!%p4054_p3)
}
  0x67   : > { %s4058_s20 = scalar_lea.vmem %s4324_s0, 4096  ;;  %s4135_s23 = smov [#allocation7]  }
  0x68   : > { %p4059_p4 = scmp.ne.s32.totalorder %s4324_s0, %s4058_s20  ;;  %s4063_s16 = sshll.u32 %s4135_s23, 4  ;;  %s4064_s16 = int_to_ptr.vmem [resolvable:$false] %s4063_s16 }
  0x69   : > { %s4065_s22 = scalar_lea.vmem %s4064_s16, 8192  ;;  %p4066_p5 = scmp.lt.s32.totalorder %s4324_s0, %s4064_s16 }
  0x6a   : > { %p4061_p6 = pnand %p4059_p4, %p4291_p11  ;;  %p4067_p2 = scmp.lt.s32.totalorder %s4065_s22, %s4058_s20 }
  0x6c   : > { %p4062_p8 = pneg %p4061_p6  ;;  %p4068_p12 = por %p4067_p2, %p4066_p5 }
  0x6e   : > { %p4069_p0 = pnand %p4068_p12, %p4062_p8 }
  0x70   : > { %4072 = shalt.err (!%p4069_p0)
}
  0x71   : > { %s4136_s25 = smov 64   ;;  %s4137_s15 = smov 4  }
  0x72   : > { %3726 = dma.hbm_to_vmem [thread:$0]  (!%p4267_p9), %s4320_s17, 4096, %s4324_s0, %s4285_s19, %s4136_s25, %s4136_s25, %s4137_s15  }
  0x73   : > { %p5066_p11 = scmp.ne.s32.totalorder %s5064_s12, 0 }
  0x74   : > { %s557_s13 = sand.u32 (!%p5066_p11), 1, %s4111_s26   ;;  %p5067_p10 = scmp.ne.s32.totalorder (!%p5066_p11), %s5056_s18, 0 }
  0x75   : > { %555 = sbr.rel (%p5066_p11) target bundleno = 4510 (0x119e), region = 72  ;;  %s558_s27 = scalar_lea.sflag (!%p5066_p11), [#allocation4], %s557_s13 }
  0x76   : > { %s3709_s14 = smul.u32 (!%p5066_p11), 192, %s557_s13 }
  0x78   : > { %s4390_s10 = scalar_lea.vmem (!%p5066_p11), [#allocation3], %s3709_s14 }
  0x7c   : > { %4098 = dma.done.wait (%p5067_p10), %s558_s27, 3072  }
  0x7d   : > { %4100 = vsyncadd (%p5067_p10), %s558_s27, 4294964224  ;;  %s5068_s29 = sadd.s32 4294967295, %s4127_s30   ;;  %s3327_s0 = sshll.u32 %s557_s13, 8 }
  0x7e   : > { %s566_s21 = sand.u32 1, %s5068_s29   ;;  %s4398_s12 = scalar_lea.vmem [#allocation5], %s3327_s0 }
  0x7f   : > { %s567_s19 = scalar_lea.sflag [#allocation6], %s566_s21 }
  0x80   : > { %4102 = dma.done.wait (%p5067_p10), %s567_s19, 8192  }
  0x81   : > { %4104 = vsyncadd (%p5067_p10), %s567_s19, 4294959104  ;;  %p674_p9 = scmp.lt.s32.totalorder %s4119_s28, 1  ;;  %s5069_s5 = sld [smem:[#allocation17_spill]] }
  0x82   : > { %s5071_s21 = sld [smem:[#allocation21_spill]]  ;;  %p3332_p1 = scmp.ne.s32.totalorder %s4119_s28, 0 }
  0x83   : > { %s4406_s17 = scalar_select %p674_p9, %s4119_s28, 1 }
  0x84   : > { %s5072_s9 = sld [smem:[#allocation15_spill]] (!%p3332_p1) }
  0x85   : > { %s3710_s22 = smul.u32 3, %s4406_s17  ;;  %s3461_s25 = sshll.u32 %s4406_s17, 6 }
  0x86   : > { %s694_s18 = scalar_lea.vmem %s5027_s7, %s4406_s17  ;;  %s697_s11 = scalar_lea.vmem %s5028_s8, %s4406_s17 }
  0x87   : > { %s4421_s14 = scalar_lea.vmem %s5069_s5, %s3461_s25  ;;  %s4430_s24 = scalar_lea.vmem %s5024_s4, %s3710_s22 }
  0x88   : > { %s3331_s15 = sshll.u32 %s4406_s17, 2  ;;  %s5070_s5 = sld [smem:[#allocation19_spill]] }
  0x89   : > { %s704_s19 = scalar_lea.vmem %s5071_s21, %s4406_s17  ;;  %s4450_s22 = scalar_lea.vmem [#allocation7], %s3327_s0 }
  0x8a   : > { %715 = sbr.rel (%p3332_p1) target bundleno = 145 (0x91), region = 88  ;;  %v716_v0 = vld [vmem:[%s5072_s9] sm:$0xff] (!%p3332_p1)  ;;  %v717_v1 = vld [vmem:[%s5072_s9 + $0x8] sm:$0xff] (!%p3332_p1) }
  0x8b   : > { %718 = vst [vmem:[#allocation2] sm:$0xff] (!%p3332_p1), %v716_v0  ;;  %719 = vst [vmem:[#allocation2 + $0x8] sm:$0xff] (!%p3332_p1), %v717_v1 }
  0x8e   : > { %s4444_s26 = scalar_lea.vmem %s5070_s5, %s3331_s15 }
  0x91 PF: > { %v3789_v4 = vld [vmem:[%s4390_s10 + $0x4] ss:$12 sps:$4 sm:$0xff]   ;;  %v3791_v5 = vld [vmem:[%s4390_s10] ss:$12 sps:$4 sm:$0xff]   ;;  %v4138_v6 = vmov 0.0   ;;  %v4139_v32 = vmov 0   ;;  %s5074_s15 = scalar_lea.vmem %s5022_s2, %s4406_s17  ;;  %v798_v55 = vlaneseq  ;;  %s5077_s29 = scalar_lea.vmem %s5026_s6, %s4406_s17 }
  0x92   : > { %v720_v2 = vld [vmem:[#allocation2] sm:$0xff]  ;;  %v721_v3 = vld [vmem:[#allocation2 + $0x8] sm:$0xff]  ;;  %3559 = vmatprep.subr.bf16.mxu1 %v4138_v6  ;;  %941 = vmatprep.subr.bf16.mxu0 %v3789_v4  ;;  %v3796_v18 = vld [vmem:[%s4390_s10 + $0x20] ss:$12 sps:$4 sm:$0xff]   ;;  %vm4140_vm0 = vmmov 0   ;;  %vm1052_vm1 = vcmask 261120  }
  0x93   : > { %724 = vadd.xlane.f32.xlu0 %v720_v2  ;;  %v3792_v7 = vld [vmem:[%s4390_s10 + $0x8] ss:$12 sps:$4 sm:$0xff]   ;;  %942 = vmatpush1.bf16.msra.mxu0 %v3791_v5  ;;  %v3795_v17 = vld [vmem:[%s4390_s10 + $0x18] ss:$12 sps:$4 sm:$0xff]   ;;  %v3799_v20 = vld [vmem:[%s4390_s10 + $0x30] ss:$12 sps:$4 sm:$0xff]  }
  0x94   : > { %v3793_v8 = vld [vmem:[%s4390_s10 + $0x1c] ss:$12 sps:$4 sm:$0xff]   ;;  %3560 = vmatpush3.bf16.msra.mxu1 %v3792_v7  ;;  %v3797_v19 = vld [vmem:[%s4390_s10 + $0x34] ss:$12 sps:$4 sm:$0xff]   ;;  %v3800_v21 = vld [vmem:[%s4390_s10 + $0x38] ss:$12 sps:$4 sm:$0xff]   ;;  %973 = vmatprep.mubr.bf16.mxu0 %v4139_v32 }
  0x95   : > { %943 = vmatprep.subr.bf16.mxu0 %v3793_v8  ;;  %3561 = vmatprep.subr.bf16.mxu1 %v4138_v6  ;;  %v3801_v22 = vld [vmem:[%s4390_s10 + $0x4c] ss:$12 sps:$4 sm:$0xff]   ;;  %v3803_v23 = vld [vmem:[%s4390_s10 + $0x48] ss:$12 sps:$4 sm:$0xff]   ;;  %v3804_v24 = vld [vmem:[%s4390_s10 + $0x50] ss:$12 sps:$4 sm:$0xff]  }
  0x96   : > { %v3805_v25 = vld [vmem:[%s4390_s10 + $0x64] ss:$12 sps:$4 sm:$0xff]   ;;  %v3807_v26 = vld [vmem:[%s4390_s10 + $0x60] ss:$12 sps:$4 sm:$0xff]   ;;  %v3808_v27 = vld [vmem:[%s4390_s10 + $0x68] ss:$12 sps:$4 sm:$0xff]   ;;  %3575 = vmatprep.mubr.msk.bf16.mxu1 %vm4140_vm0, %v4138_v6 }
  0x97   : > { %726 = vadd.xlane.f32.xlu0 %v721_v3  ;;  %944 = vmatpush1.bf16.msra.mxu0 %v3795_v17  ;;  %v3809_v28 = vld [vmem:[%s4390_s10 + $0x7c] ss:$12 sps:$4 sm:$0xff]   ;;  %v3811_v29 = vld [vmem:[%s4390_s10 + $0x78] ss:$12 sps:$4 sm:$0xff]   ;;  %v3812_v30 = vld [vmem:[%s4390_s10 + $0x80] ss:$12 sps:$4 sm:$0xff]  }
  0x98   : > { %3562 = vmatpush3.bf16.msra.mxu1 %v3796_v18  ;;  %945 = vmatprep.subr.bf16.mxu0 %v3797_v19  ;;  %v3813_v31 = vld [vmem:[%s4390_s10 + $0x94] ss:$12 sps:$4 sm:$0xff]   ;;  %v3815_v33 = vld [vmem:[%s4390_s10 + $0x90] ss:$12 sps:$4 sm:$0xff]   ;;  %v3816_v34 = vld [vmem:[%s4390_s10 + $0x98] ss:$12 sps:$4 sm:$0xff]  }
  0x99   : > { %3563 = vmatprep.subr.bf16.mxu1 %v4138_v6  ;;  %v3817_v35 = vld [vmem:[%s4390_s10 + $0xac] ss:$12 sps:$4 sm:$0xff]   ;;  %v3819_v36 = vld [vmem:[%s4390_s10 + $0xa8] ss:$12 sps:$4 sm:$0xff]   ;;  %v3820_v37 = vld [vmem:[%s4390_s10 + $0xb0] ss:$12 sps:$4 sm:$0xff]   ;;  %s5073_s10 = scalar_lea.vmem %s5021_s1, %s4406_s17 }
  0x9a   : > { %v3333_v46 = vld [vmem:[%s5073_s10] ss:$0 sm:$0xff]  ;;  %v4520_v56 = vshrl.u32 %v798_v55, 7  ;;  %vm1177_vm2 = vcmask 1043456   ;;  %vm1149_vm4 = vcmask 64512   ;;  %s4142_s25 = smov 64  }
  0x9b   : > { %946 = vmatpush1.bf16.msra.mxu0 %v3799_v20  ;;  %v3334_v50 = vld [vmem:[%s5074_s15] ss:$0 sm:$0xff]  ;;  %s4143_s13 = smov 32  }
  0x9c   : > { %3564 = vmatpush3.bf16.msra.mxu1 %v3800_v21  ;;  %947 = vmatprep.subr.bf16.mxu0 %v3801_v22  ;;  %v804_v57 = vsub.s32 1, %v4520_v56  ;;  %v796_v58 = vld [vmem:[%s4430_s24] sm:$0x7]  ;;  %v808_v59 = vsub.s32 2, %v4520_v56  ;;  %v800_v61 = vsub.s32 0, %v4520_v56  ;;  %s4141_s24 = smov 96  }
  0x9d   : > { %3565 = vmatprep.subr.bf16.mxu1 %v4138_v6 }
  0x9e   : > { %v805_v60 = vrot.slane %v796_v58, %v804_v57 }
  0x9f   : > { %948 = vmatpush1.bf16.msra.mxu0 %v3803_v23 }
  0xa0   : > { %3566 = vmatpush3.bf16.msra.mxu1 %v3804_v24  ;;  %949 = vmatprep.subr.bf16.mxu0 %v3805_v25  ;;  %v1028_v25 = vand.u32 127, %v798_v55 }
  0xa1   : > { %3567 = vmatprep.subr.bf16.mxu1 %v4138_v6 }
  0xa2   : > { %vm4565_vm3 = vcmp.le.s32.totalorder %v1028_v25, %v4520_v56 }
  0xa3   : > { %950 = vmatpush1.bf16.msra.mxu0 %v3807_v26 }
  0xa4   : > { %3568 = vmatpush3.bf16.msra.mxu1 %v3808_v27  ;;  %951 = vmatprep.subr.bf16.mxu0 %v3809_v28 }
  0xa5   : > { %3569 = vmatprep.subr.bf16.mxu1 %v4138_v6 }
  0xa7   : > { %952 = vmatpush1.bf16.msra.mxu0 %v3811_v29 }
  0xa8   : > { %3570 = vmatpush3.bf16.msra.mxu1 %v3812_v30  ;;  %953 = vmatprep.subr.bf16.mxu0 %v3813_v31 }
  0xa9   : > { %3571 = vmatprep.subr.bf16.mxu1 %v4138_v6 }
  0xab   : > { %954 = vmatpush1.bf16.msra.mxu0 %v3815_v33 }
  0xac   : > { %3572 = vmatpush3.bf16.msra.mxu1 %v3816_v34  ;;  %955 = vmatprep.subr.bf16.mxu0 %v3817_v35 }
  0xad   : > { %3573 = vmatprep.subr.bf16.mxu1 %v4138_v6 }
  0xaf   : > { %956 = vmatpush1.bf16.msra.mxu0 %v3819_v36 }
  0xb0   : > { %3574 = vmatpush3.bf16.msra.mxu1 %v3820_v37  ;;  %3579 = vmatprep.subr.bf16.mxu0 %v4138_v6 }
  0xb1   : > { %3585 = vmatprep.subr.bf16.mxu1 %v4138_v6 }
 0x120   : > { %v725_v9 = vpop.xlane.xlu0 %724 }
 0x121   : > { %v729_v10 = vmul.f32 0.0078125, %v725_v9  ;;  %v801_v9 = vrot.slane %v796_v58, %v800_v61 }
 0x123   : > { %v4465_v11 = vsub.f32 %v720_v2, %v729_v10  ;;  %v809_v2 = vrot.slane %v796_v58, %v808_v59 }
 0x124   : > { %v727_v12 = vpop.xlane.xlu0 %726 }
 0x125   : > { %v730_v13 = vmul.f32 0.0078125, %v727_v12  ;;  %v733_v14 = vmul.f32 %v4465_v11, %v4465_v11 }
 0x127   : > { %v4469_v15 = vsub.f32 %v721_v3, %v730_v13  ;;  %735 = vadd.xlane.f32.xlu1 %v733_v14 }
 0x129   : > { %v734_v16 = vmul.f32 %v4469_v15, %v4469_v15 }
 0x12b   : > { %737 = vadd.xlane.f32.xlu1 %v734_v16 }
 0x1b4   : > { %v736_v38 = vpop.xlane.xlu1 %735 }
 0x1b5   : > { %v739_v39 = vmul.f32 0.0078125, %v736_v38 }
 0x1b7   : > { %v741_v40 = vadd.f32 1e-05, %v739_v39 }
 0x1b8   : > { %v738_v41 = vpop.xlane.xlu1 %737 }
 0x1b9   : > { %3909 = vrsqrt.f32 %v741_v40  ;;  %v740_v42 = vmul.f32 0.0078125, %v738_v41 }
 0x1bb   : > { %v742_v43 = vadd.f32 1e-05, %v740_v42 }
 0x1bd   : > { %3911 = vrsqrt.f32 %v742_v43 }
 0x1c3   : > { %v3910_v44 = vpop.eup %3909 }
 0x1c4   : > { %v745_v45 = vmul.f32 %v3910_v44, %v4465_v11 }
 0x1c6   : > { %v753_v49 = vmul.f32 %v3333_v46, %v745_v45 }
 0x1c7   : > { %v3912_v47 = vpop.eup %3911 }
 0x1c8   : > { %v746_v48 = vmul.f32 %v3912_v47, %v4469_v15  ;;  %v761_v52 = vadd.f32 %v3334_v50, %v753_v49 }
 0x1ca   : > { %v754_v51 = vmul.f32 %v3333_v46, %v746_v48 }
 0x1cc   : > { %v762_v53 = vadd.f32 %v3334_v50, %v754_v51 }
 0x1ce   : > { %v763_v54 = vpack.c.bf16 %v762_v53, %v761_v52 }
 0x1d0   : > { %974 = vmatmul.mubr.bf16.vlgmr.msra.gmra.mrb[0].mxu0 %v763_v54  ;;  %3576 = vmatmul.mubr.bf16.vlgmr.msra.gmra.mrb[0].mxu1 %v763_v54 }
 0x1d1   : > { %3581 = vmatprep.mubr.msk.bf16.mxu0 %vm4140_vm0, %v4138_v6  ;;  %3587 = vmatprep.mubr.msk.bf16.mxu1 %vm4140_vm0, %v4138_v6 }
 0x2a3   : > { %v975_v62 = vpop.f32.mrb[0].mxu0  ;;  %v1018_v63 = vpop.f32.mrb[0].mxu1 }
 0x2a4   : > { %v977_v0 = vpop.f32.mrb[1].mxu0  ;;  %v3577_v1 = vpop.f32.mrb[1].mxu1  ;;  %v1019_v12 = vadd.f32 %v1018_v63, %v809_v2  ;;  %v976_v15 = vadd.f32 %v975_v62, %v801_v9 }
 0x2a5   : > { %v978_v3 = vadd.f32 %v977_v0, %v805_v60  ;;  %v979_v4 = vpop.f32.mrb[2].mxu0  ;;  %v1021_v5 = vpop.f32.mrb[2].mxu1 }
 0x2a6   : > { %v981_v7 = vpop.f32.mrb[3].mxu0  ;;  %v3578_v8 = vpop.f32.mrb[3].mxu1  ;;  %v1022_v16 = vadd.f32 %v1021_v5, %v809_v2  ;;  %v4541_v18 = vpack.c.bf16 %v1019_v12, %v1019_v12  ;;  %v980_v19 = vadd.f32 %v979_v4, %v801_v9  ;;  %v4544_v20 = vpack.c.bf16 %v976_v15, %v976_v15 }
 0x2a7   : > { %v4532_v10 = vpack.c.bf16 %v978_v3, %v978_v3  ;;  %v982_v11 = vadd.f32 %v981_v7, %v805_v60 }
 0x2a8   : > { %v4546_v21 = vpack.c.bf16 %v1022_v16, %v1022_v16  ;;  %v4548_v22 = vpack.c.bf16 %v980_v19, %v980_v19  ;;  %v1179_v23 = vsel %vm1177_vm2, %v4541_v18, 0 }
 0x2a9   : > { %v4534_v13 = vpack.c.bf16 %v982_v11, %v982_v11  ;;  %v1057_v14 = vsel %vm1052_vm1, %v4532_v10, 0 }
 0x2aa   : > { %3580 = vmatpush3.bf16.xpose.msra.mxu0 %v1057_v14  ;;  %v1225_v24 = vsel %vm1177_vm2, %v4546_v21, 0 }
 0x2ab   : > { %v1103_v17 = vsel %vm1052_vm1, %v4534_v13, 0  ;;  %3591 = vmatprep.subr.bf16.mxu0 %v4138_v6 }
 0x2ac   : > { %3586 = vmatpush3.bf16.xpose.msra.mxu1 %v1103_v17 }
 0x2ad   : > { %3597 = vmatprep.subr.bf16.mxu1 %v4138_v6 }
 0x2b1   : > { %3582 = vmatmul.mubr.msk.bf16.vlgmr.msra.gmra.mrb[4].mxu0 %vm1052_vm1, %v4544_v20 }
 0x2b2   : > { %3592 = vmatpush3.bf16.msra.mxu0 %v1179_v23  ;;  %3593 = vmatprep.mubr.msk.bf16.mxu0 %vm4140_vm0, %v4138_v6 }
 0x2b3   : > { %3588 = vmatmul.mubr.msk.bf16.vlgmr.msra.gmra.mrb[4].mxu1 %vm1052_vm1, %v4548_v22  ;;  %3603 = vmatprep.subr.bf16.mxu0 %v4138_v6 }
 0x2b4   : > { %3598 = vmatpush3.bf16.msra.mxu1 %v1225_v24  ;;  %3599 = vmatprep.mubr.msk.bf16.mxu1 %vm4140_vm0, %v4138_v6 }
 0x2b5   : > { %3609 = vmatprep.subr.bf16.mxu1 %v4138_v6 }
 0x384   : > { %v1093_v27 = vpop.f32.mrb[4].mxu0 }
 0x385   : > { %v1147_v28 = vsel %vm4565_vm3, %v1093_v27, -1e+30  ;;  %v3583_v29 = vpop.f32.mrb[5].mxu0 }
 0x386   : > { %v1096_v30 = vpop.f32.mrb[6].mxu0  ;;  %v1139_v31 = vpop.f32.mrb[4].mxu1  ;;  %v1150_v33 = vsel %vm1149_vm4, %v1147_v28, -inf }
 0x387   : > { %v1148_v34 = vsel %vm4565_vm3, %v1139_v31, -1e+30  ;;  %v3589_v35 = vpop.f32.mrb[5].mxu1  ;;  %1151 = vmax.xlane.f32.xlu0 %v1150_v33  ;;  %v3584_v36 = vpop.f32.mrb[7].mxu0 }
 0x388   : > { %v1142_v37 = vpop.f32.mrb[6].mxu1  ;;  %v1153_v38 = vsel %vm1149_vm4, %v1148_v34, -inf }
 0x389   : > { %1154 = vmax.xlane.f32.xlu1 %v1153_v38  ;;  %v3590_v39 = vpop.f32.mrb[7].mxu1 }
 0x39a   : > { %1324 = vrot.lane.b32.xlu1 %v4534_v13, %s4141_s24 }
 0x414   : > { %v1152_v40 = vpop.xlane.xlu0 %1151 }
 0x415   : > { %v1156_v41 = vsub.f32 %v1147_v28, %v1152_v40 }
 0x416   : > { %v1155_v42 = vpop.xlane.xlu1 %1154 }
 0x417   : > { %v1158_v43 = vmul.f32 1.442695, %v1156_v41  ;;  %v1157_v44 = vsub.f32 %v1148_v34, %v1155_v42 }
 0x419   : > { %3913 = vpow2.f32 %v1158_v43  ;;  %v1160_v45 = vmul.f32 1.442695, %v1157_v44 }
 0x41a   : > { %v1325_v50 = vpop.permute.xlu1 %1324 }
 0x41b   : > { %3915 = vpow2.f32 %v1160_v45  ;;  %v1330_v1 = vsel %vm1052_vm1, %v1325_v50, 0 }
 0x423   : > { %v3914_v46 = vpop.eup %3913 }
 0x424   : > { %v1162_v47 = vsel %vm1149_vm4, %v3914_v46, 0.0 }
 0x425   : > { %v3916_v48 = vpop.eup %3915  ;;  %1163 = vadd.xlane.f32.xlu0 %v1162_v47 }
 0x426   : > { %v1165_v49 = vsel %vm1149_vm4, %v3916_v48, 0.0 }
 0x427   : > { %1166 = vadd.xlane.f32.xlu1 %v1165_v49 }
 0x438   : > { %1269 = vrot.lane.b32.xlu1 %v4544_v20, %s4141_s24 }
 0x43b   : > { %1272 = vrot.lane.b32.xlu0 %v4532_v10, %s4141_s24 }
 0x43c   : > { %1321 = vrot.lane.b32.xlu1 %v4548_v22, %s4141_s24 }
 0x4b2   : > { %v1164_v51 = vpop.xlane.xlu0 %1163 }
 0x4b3   : > { %3917 = vrcp.f32 %v1164_v51 }
 0x4b4   : > { %v1167_v52 = vpop.xlane.xlu1 %1166 }
 0x4b5   : > { %3919 = vrcp.f32 %v1167_v52  ;;  %v3823_v52 = vld [vmem:[%s4421_s14 + $0x10] sm:$0xff]  }
 0x4b6   : > { %v1273_v58 = vpop.permute.xlu0 %1272 }
 0x4b7   : > { %v1278_v63 = vsel %vm1052_vm1, %v1273_v58, 0  ;;  %v3821_v58 = vld [vmem:[%s4421_s14] sm:$0xff]  }
 0x4b8   : > { %v1270_v2 = vpop.permute.xlu1 %1269 }
 0x4bc   : > { %v1322_v3 = vpop.permute.xlu1 %1321 }
 0x4bd   : > { %v3918_v53 = vpop.eup %3917 }
 0x4be   : > { %v1170_v54 = vmul.f32 %v3918_v53, %v3914_v46 }
 0x4bf   : > { %v3920_v55 = vpop.eup %3919 }
 0x4c0   : > { %v1171_v60 = vmul.f32 %v3920_v55, %v3916_v48  ;;  %v1172_v62 = vpack.c.bf16 %v1170_v54, %v1170_v54 }
 0x4c2   : > { %3594 = vmatmul.mubr.msk.bf16.vlgmr.msra.gmra.mrb[8].mxu0 %vm1149_vm4, %v1172_v62  ;;  %v1173_v0 = vpack.c.bf16 %v1171_v60, %v1171_v60  ;;  %v3824_v62 = vld [vmem:[%s4421_s14 + $0x18] sm:$0xff]  }
 0x4c3   : > { %3604 = vmatpush3.bf16.xpose.msra.mxu0 %v1278_v63  ;;  %3605 = vmatprep.mubr.msk.bf16.mxu0 %vm4140_vm0, %v4138_v6  ;;  %v3822_v63 = vld [vmem:[%s4421_s14 + $0x8] sm:$0xff]  }
 0x4c4   : > { %3600 = vmatmul.mubr.msk.bf16.vlgmr.msra.gmra.mrb[8].mxu1 %vm1149_vm4, %v1173_v0  ;;  %3615 = vmatprep.subr.bf16.mxu0 %v4138_v6 }
 0x4c5   : > { %3610 = vmatpush3.bf16.xpose.msra.mxu1 %v1330_v1  ;;  %3611 = vmatprep.mubr.msk.bf16.mxu1 %vm4140_vm0, %v4138_v6 }
 0x4c6   : > { %3621 = vmatprep.subr.bf16.mxu1 %v4138_v6 }
 0x4ca   : > { %3606 = vmatmul.mubr.msk.bf16.vlgmr.msra.gmra.mrb[12].mxu0 %vm1052_vm1, %v1270_v2 }
 0x4cb   : > { %3617 = vmatprep.mubr.msk.bf16.mxu0 %vm4140_vm0, %v4138_v6 }
 0x4cc   : > { %3612 = vmatmul.mubr.msk.bf16.vlgmr.msra.gmra.mrb[12].mxu1 %vm1052_vm1, %v1322_v3 }
 0x4cd   : > { %3623 = vmatprep.mubr.msk.bf16.mxu1 %vm4140_vm0, %v4138_v6 }
 0x595   : > { %v4601_v4 = vpop.f32.mrb[8].mxu0 }
 0x596   : > { %v3595_v5 = vpop.f32.mrb[9].mxu0 }
 0x597   : > { %v1218_v7 = vpop.f32.mrb[10].mxu0  ;;  %v4603_v8 = vpop.f32.mrb[8].mxu1 }
 0x598   : > { %v1267_v9 = vpack.c.bf16 %v4603_v8, %v4601_v4  ;;  %v3596_v11 = vpop.f32.mrb[11].mxu0  ;;  %v3601_v12 = vpop.f32.mrb[9].mxu1 }
 0x599   : > { %v1264_v14 = vpop.f32.mrb[10].mxu1 }
 0x59a   : > { %v3602_v15 = vpop.f32.mrb[11].mxu1 }
 0x59d   : > { %v1314_v16 = vpop.f32.mrb[12].mxu0 }
 0x59e   : > { %v1372_v17 = vsel %vm4565_vm3, %v1314_v16, -1e+30  ;;  %v3607_v19 = vpop.f32.mrb[13].mxu0 }
 0x59f   : > { %v1317_v23 = vpop.f32.mrb[14].mxu0  ;;  %v1366_v24 = vpop.f32.mrb[12].mxu1  ;;  %v1374_v25 = vsel %vm1149_vm4, %v1372_v17, -inf }
 0x5a0   : > { %v1373_v27 = vsel %vm4565_vm3, %v1366_v24, -1e+30  ;;  %v3613_v28 = vpop.f32.mrb[13].mxu1  ;;  %1375 = vmax.xlane.f32.xlu0 %v1374_v25  ;;  %v3608_v29 = vpop.f32.mrb[15].mxu0 }
 0x5a1   : > { %v1369_v30 = vpop.f32.mrb[14].mxu1  ;;  %v1377_v31 = vsel %vm1149_vm4, %v1373_v27, -inf }
 0x5a2   : > { %1378 = vmax.xlane.f32.xlu1 %v1377_v31  ;;  %v3614_v33 = vpop.f32.mrb[15].mxu1 }
 0x5b3   : > { %1448 = vrot.lane.b32.xlu1 %v4546_v21, %s4141_s24 }
 0x5b7   : > { %1611 = vrot.lane.b32.xlu1 %v4532_v10, %s4142_s25 }
 0x5bb   : > { %1661 = vrot.lane.b32.xlu1 %v4534_v13, %s4142_s25 }
 0x5bf   : > { %1659 = vrot.lane.b32.xlu1 %v4548_v22, %s4142_s25 }
 0x62d   : > { %v1376_v34 = vpop.xlane.xlu0 %1375 }
 0x62e   : > { %v1380_v35 = vsub.f32 %v1372_v17, %v1376_v34 }
 0x62f   : > { %v1379_v36 = vpop.xlane.xlu1 %1378 }
 0x630   : > { %v1382_v37 = vmul.f32 1.442695, %v1380_v35  ;;  %v1381_v38 = vsub.f32 %v1373_v27, %v1379_v36 }
 0x632   : > { %3921 = vpow2.f32 %v1382_v37  ;;  %v1384_v39 = vmul.f32 1.442695, %v1381_v38 }
 0x633   : > { %v1449_v40 = vpop.permute.xlu1 %1448 }
 0x634   : > { %3923 = vpow2.f32 %v1384_v39  ;;  %v1454_v41 = vsel %vm1177_vm2, %v1449_v40, 0 }
 0x635   : > { %3622 = vmatpush3.bf16.msra.mxu1 %v1454_v41 }
 0x636   : > { %3635 = vmatprep.subr.bf16.mxu1 %v4138_v6 }
 0x637   : > { %v1612_v0 = vpop.permute.xlu1 %1611 }
 0x638   : > { %v1617_v15 = vsel %vm1052_vm1, %v1612_v0, 0 }
 0x63b   : > { %v1662_v1 = vpop.permute.xlu1 %1661 }
 0x63c   : > { %v3922_v42 = vpop.eup %3921  ;;  %v1667_v2 = vsel %vm1052_vm1, %v1662_v1, 0 }
 0x63d   : > { %v1386_v43 = vsel %vm1149_vm4, %v3922_v42, 0.0 }
 0x63e   : > { %v3924_v44 = vpop.eup %3923  ;;  %1387 = vadd.xlane.f32.xlu0 %v1386_v43 }
 0x63f   : > { %v1389_v45 = vsel %vm1149_vm4, %v3924_v44, 0.0  ;;  %v1660_v3 = vpop.permute.xlu1 %1659 }
 0x642   : > { %1390 = vadd.xlane.f32.xlu0 %v1389_v45 }
 0x658   : > { %1399 = vrot.lane.b32.xlu0 %v4541_v18, %s4141_s24 }
 0x65c   : > { %1609 = vrot.lane.b32.xlu0 %v4544_v20, %s4142_s25 }
 0x6cb   : > { %v1388_v46 = vpop.xlane.xlu0 %1387 }
 0x6cc   : > { %3925 = vrcp.f32 %v1388_v46 }
 0x6cf   : > { %v1391_v47 = vpop.xlane.xlu0 %1390 }
 0x6d0   : > { %3927 = vrcp.f32 %v1391_v47 }
 0x6d3   : > { %v1400_v48 = vpop.permute.xlu0 %1399 }
 0x6d4   : > { %v1405_v49 = vsel %vm1177_vm2, %v1400_v48, 0 }
 0x6d5   : > { %3616 = vmatpush3.bf16.msra.mxu0 %v1405_v49 }
 0x6d6   : > { %v3926_v50 = vpop.eup %3925  ;;  %3627 = vmatprep.subr.bf16.mxu0 %v4138_v6 }
 0x6d7   : > { %v1394_v51 = vmul.f32 %v3926_v50, %v3922_v42  ;;  %v1610_v23 = vpop.permute.xlu0 %1609 }
 0x6d9   : > { %v1396_v53 = vpack.c.bf16 %v1394_v51, %v1394_v51 }
 0x6da   : > { %v3928_v54 = vpop.eup %3927 }
 0x6db   : > { %v1395_v55 = vmul.f32 %v3928_v54, %v3924_v44  ;;  %3618 = vmatmul.mubr.msk.bf16.vlgmr.msra.gmra.mrb[16].mxu0 %vm1149_vm4, %v1396_v53 }
 0x6dc   : > { %3628 = vmatpush3.bf16.msra.mxu0 %v3823_v52  ;;  %3631 = vmatprep.mubr.msk.bf16.mxu0 %vm4140_vm0, %v4138_v6 }
 0x6dd   : > { %v1397_v60 = vpack.c.bf16 %v1395_v55, %v1395_v55  ;;  %3629 = vmatprep.subr.bf16.mxu0 %v4138_v6 }
 0x6df   : > { %3624 = vmatmul.mubr.msk.bf16.vlgmr.msra.gmra.mrb[16].mxu1 %vm1149_vm4, %v1397_v60 }
 0x6e0   : > { %3636 = vmatpush3.bf16.msra.mxu1 %v3821_v58  ;;  %3639 = vmatprep.mubr.msk.bf16.mxu1 %vm4140_vm0, %v4138_v6 }
 0x6e1   : > { %3637 = vmatprep.subr.bf16.mxu1 %v4138_v6  ;;  %3630 = vmatpush3.bf16.msra.mxu0 %v3824_v62 }
 0x6e2   : > { %3643 = vmatprep.subr.bf16.mxu0 %v4138_v6 }
 0x6e4   : > { %3638 = vmatpush3.bf16.msra.mxu1 %v3822_v63 }
 0x6e5   : > { %3649 = vmatprep.subr.bf16.mxu1 %v4138_v6 }
 0x6e7   : > { %3640 = vmatmul.mubr.msk.bf16.vlgmr.msra.gmra.mrb[20].mxu1 %vm1052_vm1, %v1267_v9 }
 0x6e8   : > { %3651 = vmatprep.mubr.msk.bf16.mxu1 %vm4140_vm0, %v4138_v6 }
 0x6ed   : > { %3650 = vmatpush3.bf16.xpose.msra.mxu1 %v1667_v2 }
 0x6ee   : > { %3661 = vmatprep.subr.bf16.mxu1 %v4138_v6 }
 0x6f4   : > { %3652 = vmatmul.mubr.msk.bf16.vlgmr.msra.gmra.mrb[24].mxu1 %vm1052_vm1, %v1660_v3 }
 0x6f5   : > { %3663 = vmatprep.mubr.msk.bf16.mxu1 %vm4140_vm0, %v4138_v6 }
 0x7ae   : > { %v1441_v5 = vpop.f32.mrb[16].mxu0 }
 0x7af   : > { %v3619_v7 = vpop.f32.mrb[17].mxu0 }
 0x7b0   : > { %v1444_v4 = vpop.f32.mrb[18].mxu0 }
 0x7b1   : > { %v3620_v8 = vpop.f32.mrb[19].mxu0 }
 0x7b2   : > { %v1490_v9 = vpop.f32.mrb[16].mxu1  ;;  %v3825_v8 = vld [vmem:[%s4421_s14 + $0x20] sm:$0xff]  }
 0x7b3   : > { %v1496_v11 = vpack.c.bf16 %v1490_v9, %v1441_v5  ;;  %v3625_v12 = vpop.f32.mrb[17].mxu1 }
 0x7b4   : > { %v1493_v14 = vpop.f32.mrb[18].mxu1 }
 0x7b5   : > { %v3626_v16 = vpop.f32.mrb[19].mxu1  ;;  %3632 = vmatmul.mubr.msk.bf16.vlgmr.msra.gmra.mrb[20].mxu0 %vm1052_vm1, %v1496_v11 }
 0x7b6   : > { %3644 = vmatpush3.bf16.xpose.msra.mxu0 %v1617_v15  ;;  %3645 = vmatprep.mubr.msk.bf16.mxu0 %vm4140_vm0, %v4138_v6  ;;  %v3826_v15 = vld [vmem:[%s4421_s14 + $0x28] sm:$0xff]  }
 0x7b7   : > { %3655 = vmatprep.subr.bf16.mxu0 %v4138_v6 }
 0x7ba   : > { %v1602_v17 = vpop.f32.mrb[20].mxu1 }
 0x7bb   : > { %v3641_v19 = vpop.f32.mrb[21].mxu1 }
 0x7bc   : > { %v1605_v24 = vpop.f32.mrb[22].mxu1 }
 0x7bd   : > { %v3642_v25 = vpop.f32.mrb[23].mxu1  ;;  %3646 = vmatmul.mubr.msk.bf16.vlgmr.msra.gmra.mrb[24].mxu0 %vm1052_vm1, %v1610_v23 }
 0x7be   : > { %3657 = vmatprep.mubr.msk.bf16.mxu0 %vm4140_vm0, %v4138_v6 }
 0x7c7   : > { %v1703_v27 = vpop.f32.mrb[24].mxu1 }
 0x7c8   : > { %v1710_v28 = vsel %vm4565_vm3, %v1703_v27, -1e+30  ;;  %v3653_v29 = vpop.f32.mrb[25].mxu1 }
 0x7c9   : > { %v1706_v30 = vpop.f32.mrb[26].mxu1  ;;  %v1714_v31 = vsel %vm1149_vm4, %v1710_v28, -inf }
 0x7ca   : > { %1715 = vmax.xlane.f32.xlu1 %v1714_v31  ;;  %v3654_v33 = vpop.f32.mrb[27].mxu1 }
 0x7db   : > { %1783 = vrot.lane.b32.xlu1 %v4546_v21, %s4142_s25 }
 0x7df   : > { %1892 = vrot.lane.b32.xlu1 %v4532_v10, %s4143_s13 }
 0x7e3   : > { %1942 = vrot.lane.b32.xlu1 %v4534_v13, %s4143_s13 }
 0x7e7   : > { %1940 = vrot.lane.b32.xlu1 %v4548_v22, %s4143_s13 }
 0x857   : > { %v1716_v34 = vpop.xlane.xlu1 %1715 }
 0x858   : > { %v1718_v37 = vsub.f32 %v1710_v28, %v1716_v34 }
 0x85a   : > { %v1721_v38 = vmul.f32 1.442695, %v1718_v37 }
 0x85b   : > { %v1784_v35 = vpop.permute.xlu1 %1783 }
 0x85c   : > { %v1789_v36 = vsel %vm1177_vm2, %v1784_v35, 0  ;;  %3929 = vpow2.f32 %v1721_v38 }
 0x85d   : > { %3662 = vmatpush3.bf16.msra.mxu1 %v1789_v36 }
 0x85e   : > { %3675 = vmatprep.subr.bf16.mxu1 %v4138_v6 }
 0x85f   : > { %v1893_v62 = vpop.permute.xlu1 %1892 }
 0x860   : > { %v1898_v0 = vsel %vm1052_vm1, %v1893_v62, 0 }
 0x863   : > { %v1943_v27 = vpop.permute.xlu1 %1942 }
 0x864   : > { %v1948_v33 = vsel %vm1052_vm1, %v1943_v27, 0 }
 0x866   : > { %v3930_v47 = vpop.eup %3929 }
 0x867   : > { %v1726_v49 = vsel %vm1149_vm4, %v3930_v47, 0.0  ;;  %v1941_v35 = vpop.permute.xlu1 %1940 }
 0x888   : > { %v1546_v39 = vpop.f32.mrb[20].mxu0 }
 0x889   : > { %v4677_v40 = vadd.f32 %v1602_v17, %v1546_v39  ;;  %v3633_v10 = vpop.f32.mrb[21].mxu0 }
 0x88a   : > { %v1549_v41 = vpop.f32.mrb[22].mxu0 }
 0x88b   : > { %v4679_v42 = vadd.f32 %v1605_v24, %v1549_v41  ;;  %v3634_v13 = vpop.f32.mrb[23].mxu0 }
 0x890   : > { %v1653_v43 = vpop.f32.mrb[24].mxu0 }
 0x891   : > { %v1709_v22 = vsel %vm4565_vm3, %v1653_v43, -1e+30  ;;  %v3647_v44 = vpop.f32.mrb[25].mxu0 }
 0x892   : > { %v1656_v45 = vpop.f32.mrb[26].mxu0  ;;  %v1711_v46 = vsel %vm1149_vm4, %v1709_v22, -inf }
 0x893   : > { %1712 = vmax.xlane.f32.xlu0 %v1711_v46  ;;  %v3648_v48 = vpop.f32.mrb[27].mxu0 }
 0x897   : > { %1727 = vadd.xlane.f32.xlu0 %v1726_v49 }
 0x920   : > { %v1713_v50 = vpop.xlane.xlu0 %1712 }
 0x921   : > { %v1717_v51 = vsub.f32 %v1709_v22, %v1713_v50 }
 0x923   : > { %v1719_v52 = vmul.f32 1.442695, %v1717_v51 }
 0x924   : > { %v1728_v53 = vpop.xlane.xlu0 %1727 }
 0x925   : > { %3931 = vpow2.f32 %v1719_v52 }
 0x926   : > { %3933 = vrcp.f32 %v1728_v53 }
 0x92f   : > { %v3932_v54 = vpop.eup %3931 }
 0x930   : > { %v3934_v55 = vpop.eup %3933  ;;  %v1723_v58 = vsel %vm1149_vm4, %v3932_v54, 0.0 }
 0x931   : > { %v1732_v60 = vmul.f32 %v3934_v55, %v3930_v47  ;;  %1724 = vadd.xlane.f32.xlu0 %v1723_v58 }
 0x933   : > { %v1734_v63 = vpack.c.bf16 %v1732_v60, %v1732_v60 }
 0x935   : > { %3664 = vmatmul.mubr.msk.bf16.vlgmr.msra.gmra.mrb[28].mxu1 %vm1149_vm4, %v1734_v63 }
 0x936   : > { %3676 = vmatpush3.bf16.xpose.msra.mxu1 %v1898_v0  ;;  %3677 = vmatprep.mubr.msk.bf16.mxu1 %vm4140_vm0, %v4138_v6 }
 0x937   : > { %3687 = vmatprep.subr.bf16.mxu1 %v4138_v6 }
 0x947   : > { %1735 = vrot.lane.b32.xlu0 %v4541_v18, %s4142_s25 }
 0x94b   : > { %1890 = vrot.lane.b32.xlu0 %v4544_v20, %s4143_s13 }
 0x9be   : > { %v1725_v1 = vpop.xlane.xlu0 %1724 }
 0x9bf   : > { %3935 = vrcp.f32 %v1725_v1 }
 0x9c2   : > { %v1736_v2 = vpop.permute.xlu0 %1735 }
 0x9c3   : > { %v1741_v3 = vsel %vm1177_vm2, %v1736_v2, 0 }
 0x9c4   : > { %3656 = vmatpush3.bf16.msra.mxu0 %v1741_v3 }
 0x9c5   : > { %3667 = vmatprep.subr.bf16.mxu0 %v4138_v6 }
 0x9c6   : > { %v1891_v5 = vpop.permute.xlu0 %1890 }
 0x9c7   : > { %3678 = vmatmul.mubr.msk.bf16.vlgmr.msra.gmra.mrb[32].mxu1 %vm1052_vm1, %v1891_v5  ;;  %v3827_v5 = vld [vmem:[%s4421_s14 + $0x30] sm:$0xff]  }
 0x9c8   : > { %3689 = vmatprep.mubr.msk.bf16.mxu1 %vm4140_vm0, %v4138_v6 }
 0x9c9   : > { %v3936_v7 = vpop.eup %3935 }
 0x9ca   : > { %v1731_v4 = vmul.f32 %v3936_v7, %v3932_v54  ;;  %v3828_v7 = vld [vmem:[%s4421_s14 + $0x38] sm:$0xff]  }
 0x9cc   : > { %v1733_v9 = vpack.c.bf16 %v1731_v4, %v1731_v4 }
 0x9ce   : > { %3658 = vmatmul.mubr.msk.bf16.vlgmr.msra.gmra.mrb[28].mxu0 %vm1149_vm4, %v1733_v9 }
 0x9cf   : > { %3668 = vmatpush3.bf16.msra.mxu0 %v3825_v8  ;;  %3671 = vmatprep.mubr.msk.bf16.mxu0 %vm4140_vm0, %v4138_v6 }
 0x9d0   : > { %3669 = vmatprep.subr.bf16.mxu0 %v4138_v6 }
 0x9d3   : > { %3670 = vmatpush3.bf16.msra.mxu0 %v3826_v15 }
 0x9d4   : > { %3681 = vmatprep.subr.bf16.mxu0 %v4138_v6 }
 0xa08   : > { %v1825_v20 = vpop.f32.mrb[28].mxu1 }
 0xa09   : > { %v3665_v11 = vpop.f32.mrb[29].mxu1 }
 0xa0a   : > { %v1828_v12 = vpop.f32.mrb[30].mxu1 }
 0xa0b   : > { %v3666_v14 = vpop.f32.mrb[31].mxu1 }
 0xa9a   : > { %v1934_v16 = vpop.f32.mrb[32].mxu1 }
 0xa9b   : > { %v1990_v17 = vsel %vm4565_vm3, %v1934_v16, -1e+30  ;;  %v3679_v19 = vpop.f32.mrb[33].mxu1 }
 0xa9c   : > { %v1937_v23 = vpop.f32.mrb[34].mxu1  ;;  %v1992_v24 = vsel %vm1149_vm4, %v1990_v17, -inf }
 0xa9d   : > { %1993 = vmax.xlane.f32.xlu0 %v1992_v24  ;;  %v3680_v25 = vpop.f32.mrb[35].mxu1  ;;  %v3387_v24 = vld [vmem:[%s5077_s29] ss:$0 sm:$0xff] }
 0xa9e   : > { %v3981_v25 = vld [vmem:[#allocation2] sm:$0xff] }
 0xaa1   : > { %v1777_v28 = vpop.f32.mrb[28].mxu0 }
 0xaa2   : > { %v1831_v29 = vpack.c.bf16 %v1825_v20, %v1777_v28  ;;  %v3659_v30 = vpop.f32.mrb[29].mxu0 }
 0xaa3   : > { %v1780_v31 = vpop.f32.mrb[30].mxu0 }
 0xaa4   : > { %v3660_v34 = vpop.f32.mrb[31].mxu0  ;;  %3672 = vmatmul.mubr.msk.bf16.vlgmr.msra.gmra.mrb[32].mxu0 %vm1052_vm1, %v1831_v29 }
 0xaa5   : > { %3682 = vmatpush3.bf16.xpose.msra.mxu0 %v1948_v33  ;;  %3683 = vmatprep.mubr.msk.bf16.mxu0 %vm4140_vm0, %v4138_v6  ;;  %v3829_v34 = vld [vmem:[%s4398_s12] ss:$16 sps:$4 sm:$0xff]  }
 0xaa6   : > { %3693 = vmatprep.subr.bf16.mxu0 %v4138_v6 }
 0xaac   : > { %3684 = vmatmul.mubr.msk.bf16.vlgmr.msra.gmra.mrb[36].mxu0 %vm1052_vm1, %v1941_v35  ;;  %v3831_v35 = vld [vmem:[%s4398_s12 + $0x4] ss:$16 sps:$4 sm:$0xff]  }
 0xaad   : > { %3695 = vmatprep.mubr.msk.bf16.mxu0 %vm4140_vm0, %v4138_v6 }
 0xb2a   : > { %v1994_v36 = vpop.xlane.xlu0 %1993 }
 0xb2b   : > { %v1998_v37 = vsub.f32 %v1990_v17, %v1994_v36  ;;  %v3832_v36 = vld [vmem:[%s4398_s12 + $0x8] ss:$16 sps:$4 sm:$0xff]  }
 0xb2d   : > { %v2000_v38 = vmul.f32 1.442695, %v1998_v37  ;;  %v3834_v37 = vld [vmem:[%s4398_s12 + $0xc] ss:$16 sps:$4 sm:$0xff]  }
 0xb2f   : > { %3937 = vpow2.f32 %v2000_v38  ;;  %v3837_v38 = vld [vmem:[%s4398_s12 + $0x24] ss:$16 sps:$4 sm:$0xff]  }
 0xb39   : > { %v3938_v39 = vpop.eup %3937 }
 0xb3a   : > { %v2004_v10 = vsel %vm1149_vm4, %v3938_v39, 0.0 }
 0xb3b   : > { %2005 = vadd.xlane.f32.xlu0 %v2004_v10  ;;  %v3835_v10 = vld [vmem:[%s4398_s12 + $0x20] ss:$16 sps:$4 sm:$0xff]  }
 0xb77   : > { %v1881_v41 = vpop.f32.mrb[32].mxu0 }
 0xb78   : > { %v1888_v13 = vadd.f32 %v1881_v41, %v4677_v40  ;;  %v3673_v43 = vpop.f32.mrb[33].mxu0  ;;  %v3838_v41 = vld [vmem:[%s4398_s12 + $0x28] ss:$16 sps:$4 sm:$0xff]  }
 0xb79   : > { %v1884_v22 = vpop.f32.mrb[34].mxu0 }
 0xb7a   : > { %v1889_v44 = vadd.f32 %v1884_v22, %v4679_v42  ;;  %v3674_v45 = vpop.f32.mrb[35].mxu0 }
 0xb7f   : > { %v1984_v46 = vpop.f32.mrb[36].mxu0 }
 0xb80   : > { %v1991_v47 = vsel %vm4565_vm3, %v1984_v46, -1e+30  ;;  %v3685_v48 = vpop.f32.mrb[37].mxu0 }
 0xb81   : > { %v1987_v49 = vpop.f32.mrb[38].mxu0  ;;  %v1995_v50 = vsel %vm1149_vm4, %v1991_v47, -inf }
 0xb82   : > { %1996 = vmax.xlane.f32.xlu1 %v1995_v50  ;;  %v3686_v51 = vpop.f32.mrb[39].mxu0  ;;  %v3843_v49 = vld [vmem:[%s4398_s12 + $0x44] ss:$16 sps:$4 sm:$0xff]   ;;  %v3846_v50 = vld [vmem:[%s4398_s12 + $0x4c] ss:$16 sps:$4 sm:$0xff]  }
 0xb83   : > { %v3841_v51 = vld [vmem:[%s4398_s12 + $0x40] ss:$16 sps:$4 sm:$0xff]  }
 0xb93   : > { %2064 = vrot.lane.b32.xlu1 %v4546_v21, %s4143_s13 }
 0xbc8   : > { %v2006_v58 = vpop.xlane.xlu0 %2005 }
 0xc0f   : > { %v1997_v52 = vpop.xlane.xlu1 %1996 }
 0xc10   : > { %v1999_v40 = vsub.f32 %v1991_v47, %v1997_v52  ;;  %v3844_v52 = vld [vmem:[%s4398_s12 + $0x48] ss:$16 sps:$4 sm:$0xff]  }
 0xc12   : > { %v2002_v53 = vmul.f32 1.442695, %v1999_v40  ;;  %v3849_v40 = vld [vmem:[%s4398_s12 + $0x64] ss:$16 sps:$4 sm:$0xff]  }
 0xc13   : > { %v2065_v54 = vpop.permute.xlu1 %2064 }
 0xc14   : > { %3939 = vpow2.f32 %v2002_v53  ;;  %v2070_v42 = vsel %vm1177_vm2, %v2065_v54, 0  ;;  %v3852_v53 = vld [vmem:[%s4398_s12 + $0x6c] ss:$16 sps:$4 sm:$0xff]   ;;  %v3847_v54 = vld [vmem:[%s4398_s12 + $0x60] ss:$16 sps:$4 sm:$0xff]  }
 0xc15   : > { %3694 = vmatpush3.bf16.msra.mxu0 %v2070_v42  ;;  %3941 = vrcp.f32 %v2006_v58  ;;  %v3850_v42 = vld [vmem:[%s4398_s12 + $0x68] ss:$16 sps:$4 sm:$0xff]   ;;  %v3853_v58 = vld [vmem:[%s4398_s12 + $0x80] ss:$16 sps:$4 sm:$0xff]  }
 0xc16   : > { %2437 = vmatprep.subr.bf16.mxu0 %v3831_v35  ;;  %v3879_v35 = vld [vmem:[%s4450_s22] sm:$0xff]  }
 0xc1e   : > { %v3940_v55 = vpop.eup %3939 }
 0xc1f   : > { %v2007_v26 = vsel %vm1149_vm4, %v3940_v55, 0.0  ;;  %v3942_v60 = vpop.eup %3941 }
 0xc20   : > { %2008 = vadd.xlane.f32.xlu0 %v2007_v26  ;;  %v2012_v62 = vmul.f32 %v3942_v60, %v3938_v39  ;;  %v3840_v39 = vld [vmem:[%s4398_s12 + $0x2c] ss:$16 sps:$4 sm:$0xff]   ;;  %v3856_v60 = vld [vmem:[%s4398_s12 + $0x88] ss:$16 sps:$4 sm:$0xff]  }
 0xc21   : > { %v3858_v26 = vld [vmem:[%s4398_s12 + $0x8c] ss:$16 sps:$4 sm:$0xff]  }
 0xc22   : > { %v2014_v1 = vpack.c.bf16 %v2012_v62, %v2012_v62  ;;  %v3864_v62 = vld [vmem:[%s4398_s12 + $0xac] ss:$16 sps:$4 sm:$0xff]  }
 0xc36   : > { %2016 = vrot.lane.b32.xlu0 %v4541_v18, %s4143_s13 }
 0xcad   : > { %v2009_v21 = vpop.xlane.xlu0 %2008 }
 0xcae   : > { %3943 = vrcp.f32 %v2009_v21  ;;  %v3861_v21 = vld [vmem:[%s4398_s12 + $0xa4] ss:$16 sps:$4 sm:$0xff]  }
 0xcb1   : > { %v2017_v63 = vpop.permute.xlu0 %2016 }
 0xcb2   : > { %v2022_v0 = vsel %vm1177_vm2, %v2017_v63, 0  ;;  %v3859_v63 = vld [vmem:[%s4398_s12 + $0xa0] ss:$16 sps:$4 sm:$0xff]  }
 0xcb3   : > { %3688 = vmatpush3.bf16.msra.mxu1 %v2022_v0  ;;  %v3862_v0 = vld [vmem:[%s4398_s12 + $0xa8] ss:$16 sps:$4 sm:$0xff]  }
 0xcb4   : > { %3699 = vmatprep.subr.bf16.mxu1 %v4138_v6 }
 0xcb6   : > { %3690 = vmatmul.mubr.msk.bf16.vlgmr.msra.gmra.mrb[36].mxu1 %vm1149_vm4, %v2014_v1  ;;  %v3865_v1 = vld [vmem:[%s4398_s12 + $0xc0] ss:$16 sps:$4 sm:$0xff]  }
 0xcb7   : > { %3703 = vmatprep.mubr.msk.bf16.mxu1 %vm4140_vm0, %v4138_v6  ;;  %3700 = vmatpush3.bf16.msra.mxu1 %v3827_v5  ;;  %v3873_v5 = vld [vmem:[%s4398_s12 + $0xe4] ss:$16 sps:$4 sm:$0xff]  }
 0xcb8   : > { %v3944_v18 = vpop.eup %3943  ;;  %3701 = vmatprep.subr.bf16.mxu1 %v4138_v6 }
 0xcb9   : > { %v2013_v2 = vmul.f32 %v3944_v18, %v3940_v55  ;;  %v3855_v55 = vld [vmem:[%s4398_s12 + $0x84] ss:$16 sps:$4 sm:$0xff]  }
 0xcba   : > { %v3867_v18 = vld [vmem:[%s4398_s12 + $0xc4] ss:$16 sps:$4 sm:$0xff]  }
 0xcbb   : > { %v2015_v3 = vpack.c.bf16 %v2013_v2, %v2013_v2  ;;  %3702 = vmatpush3.bf16.msra.mxu1 %v3828_v7  ;;  %v3868_v2 = vld [vmem:[%s4398_s12 + $0xc8] ss:$16 sps:$4 sm:$0xff]   ;;  %v3876_v7 = vld [vmem:[%s4398_s12 + $0xec] ss:$16 sps:$4 sm:$0xff]  }
 0xcbc   : > { %2480 = vmatprep.subr.bf16.mxu1 %v3834_v37  ;;  %v3881_v37 = vld [vmem:[%s4450_s22 + $0x48] sm:$0xff]  }
 0xcbd   : > { %3696 = vmatmul.mubr.msk.bf16.vlgmr.msra.gmra.mrb[40].mxu0 %vm1149_vm4, %v2015_v3  ;;  %v3870_v3 = vld [vmem:[%s4398_s12 + $0xcc] ss:$16 sps:$4 sm:$0xff]  }
 0xcbe   : > { %2469 = vmatprep.mubr.bf16.mxu0 %v4139_v32  ;;  %2438 = vmatpush1.bf16.msra.mxu0 %v3829_v34  ;;  %v3878_v34 = vld [vmem:[%s4450_s22 + $0xc0] sm:$0xff]  }
 0xcbf   : > { %2439 = vmatprep.subr.bf16.mxu0 %v3837_v38  ;;  %v3882_v38 = vld [vmem:[%s4450_s22 + $0xc8] sm:$0xff]  }
 0xcc2   : > { %2440 = vmatpush1.bf16.msra.mxu0 %v3835_v10  ;;  %v3884_v10 = vld [vmem:[%s4450_s22 + $0x88] sm:$0xff]  }
 0xcc3   : > { %2441 = vmatprep.subr.bf16.mxu0 %v3843_v49  ;;  %v3894_v49 = vld [vmem:[%s4450_s22 + $0xe0] sm:$0xff]  }
 0xcc6   : > { %2442 = vmatpush1.bf16.msra.mxu0 %v3841_v51  ;;  %v3896_v51 = vld [vmem:[%s4450_s22 + $0xa0] sm:$0xff]  }
 0xcc7   : > { %2443 = vmatprep.subr.bf16.mxu0 %v3849_v40  ;;  %v3898_v40 = vld [vmem:[%s4450_s22 + $0xe8] sm:$0xff]  }
 0xcca   : > { %2444 = vmatpush1.bf16.msra.mxu0 %v3847_v54  ;;  %v3900_v54 = vld [vmem:[%s4450_s22 + $0xa8] sm:$0xff]  }
 0xccb   : > { %2445 = vmatprep.subr.bf16.mxu0 %v3855_v55  ;;  %v3902_v55 = vld [vmem:[%s4450_s22 + $0xf0] sm:$0xff]  }
 0xcce   : > { %2446 = vmatpush1.bf16.msra.mxu0 %v3853_v58  ;;  %v3904_v58 = vld [vmem:[%s4450_s22 + $0xb0] sm:$0xff]  }
 0xccf   : > { %2447 = vmatprep.subr.bf16.mxu0 %v3861_v21  ;;  %v3906_v21 = vld [vmem:[%s4450_s22 + $0xf8] sm:$0xff]  }
 0xcd2   : > { %2448 = vmatpush1.bf16.msra.mxu0 %v3859_v63  ;;  %v3908_v63 = vld [vmem:[%s4450_s22 + $0xb8] sm:$0xff]  }
 0xcd3   : > { %2449 = vmatprep.subr.bf16.mxu0 %v3867_v18 }
 0xcd6   : > { %2450 = vmatpush1.bf16.msra.mxu0 %v3865_v1  ;;  %v2271_v1 = vsub.s32 3, %v4520_v56 }
 0xcd7   : > { %2451 = vmatprep.subr.bf16.mxu0 %v3873_v5 }
 0xd89   : > { %v2058_v4 = vpop.f32.mrb[36].mxu1 }
 0xd8a   : > { %v3691_v8 = vpop.f32.mrb[37].mxu1 }
 0xd8b   : > { %v2061_v9 = vpop.f32.mrb[38].mxu1  ;;  %v3874_v8 = vld [vmem:[%s4398_s12 + $0xe8] ss:$16 sps:$4 sm:$0xff]  }
 0xd8c   : > { %v3692_v20 = vpop.f32.mrb[39].mxu1 }
 0xd90   : > { %v2106_v11 = vpop.f32.mrb[40].mxu0 }
 0xd91   : > { %v2112_v12 = vpack.c.bf16 %v2106_v11, %v2058_v4  ;;  %v3697_v14 = vpop.f32.mrb[41].mxu0  ;;  %v3871_v4 = vld [vmem:[%s4398_s12 + $0xe0] ss:$16 sps:$4 sm:$0xff]  }
 0xd92   : > { %v2109_v15 = vpop.f32.mrb[42].mxu0  ;;  %2452 = vmatpush1.bf16.msra.mxu0 %v3871_v4 }
 0xd93   : > { %v3698_v16 = vpop.f32.mrb[43].mxu0  ;;  %3704 = vmatmul.mubr.msk.bf16.vlgmr.msra.gmra.mrb[40].mxu1 %vm1052_vm1, %v2112_v12 }
 0xd94   : > { %2512 = vmatprep.mubr.bf16.mxu1 %v4139_v32  ;;  %v3982_v32 = vld [vmem:[#allocation2 + $0x8] sm:$0xff]  ;;  %2481 = vmatpush1.bf16.msra.mxu1 %v3832_v36  ;;  %v3880_v36 = vld [vmem:[%s4450_s22 + $0x80] sm:$0xff]  }
 0xd95   : > { %2482 = vmatprep.subr.bf16.mxu1 %v3840_v39  ;;  %v3883_v39 = vld [vmem:[%s4450_s22 + $0x8] sm:$0xff]  }
 0xd98   : > { %2483 = vmatpush1.bf16.msra.mxu1 %v3838_v41  ;;  %v3885_v41 = vld [vmem:[%s4450_s22 + $0x50] sm:$0xff]  }
 0xd99   : > { %2484 = vmatprep.subr.bf16.mxu1 %v3846_v50  ;;  %v3895_v50 = vld [vmem:[%s4450_s22 + $0x20] sm:$0xff]  }
 0xd9c   : > { %2485 = vmatpush1.bf16.msra.mxu1 %v3844_v52  ;;  %v3897_v52 = vld [vmem:[%s4450_s22 + $0x68] sm:$0xff]  }
 0xd9d   : > { %2486 = vmatprep.subr.bf16.mxu1 %v3852_v53  ;;  %v3899_v53 = vld [vmem:[%s4450_s22 + $0x28] sm:$0xff]  }
 0xda0   : > { %2487 = vmatpush1.bf16.msra.mxu1 %v3850_v42  ;;  %v3901_v42 = vld [vmem:[%s4450_s22 + $0x70] sm:$0xff]  }
 0xda1   : > { %2488 = vmatprep.subr.bf16.mxu1 %v3858_v26  ;;  %v3903_v26 = vld [vmem:[%s4450_s22 + $0x30] sm:$0xff]  }
 0xda4   : > { %2489 = vmatpush1.bf16.msra.mxu1 %v3856_v60  ;;  %v3905_v60 = vld [vmem:[%s4450_s22 + $0x78] sm:$0xff]  }
 0xda5   : > { %2490 = vmatprep.subr.bf16.mxu1 %v3864_v62  ;;  %v3907_v62 = vld [vmem:[%s4450_s22 + $0x38] sm:$0xff]  }
 0xda8   : > { %2491 = vmatpush1.bf16.msra.mxu1 %v3862_v0  ;;  %v2255_v0 = vld [vmem:[%s4444_s26] sm:$0xf] }
 0xda9   : > { %2492 = vmatprep.subr.bf16.mxu1 %v3870_v3  ;;  %v2260_v18 = vrot.slane %v2255_v0, %v800_v61  ;;  %v2264_v3 = vrot.slane %v2255_v0, %v804_v57  ;;  %v2272_v5 = vrot.slane %v2255_v0, %v2271_v1 }
 0xdac   : > { %2493 = vmatpush1.bf16.msra.mxu1 %v3868_v2  ;;  %v2268_v2 = vrot.slane %v2255_v0, %v808_v59 }
 0xdad   : > { %2494 = vmatprep.subr.bf16.mxu1 %v3876_v7 }
 0xdb0   : > { %2495 = vmatpush1.bf16.msra.mxu1 %v3874_v8 }
 0xdb1   : > { %3537 = vmatprep.subr.bf16.mxu1 %v3878_v34 }
 0xe66   : > { %v2162_v17 = vpop.f32.mrb[40].mxu1 }
 0xe67   : > { %v2169_v6 = vadd.f32 %v2162_v17, %v1888_v13  ;;  %v3705_v19 = vpop.f32.mrb[41].mxu1  ;;  %v3388_v17 = vld [vmem:[%s694_s18] ss:$0 sm:$0xff] }
 0xe68   : > { %v2165_v23 = vpop.f32.mrb[42].mxu1 }
 0xe69   : > { %v2171_v27 = vadd.f32 %v3981_v25, %v2169_v6  ;;  %v2170_v28 = vadd.f32 %v2165_v23, %v1889_v44  ;;  %v3706_v29 = vpop.f32.mrb[43].mxu1  ;;  %v3389_v25 = vld [vmem:[%s697_s11] ss:$0 sm:$0xff] }
 0xe6b   : > { %v2172_v30 = vadd.f32 %v3982_v32, %v2170_v28  ;;  %v4747_v31 = vadd.f32 %v3387_v24, %v2171_v27 }
 0xe6d   : > { %2184 = vadd.xlane.f32.xlu1 %v4747_v31  ;;  %v4750_v33 = vadd.f32 %v3387_v24, %v2172_v30  ;;  %v3877_v30 = vld [vmem:[%s4450_s22 + $0x40] sm:$0xff]  }
 0xe6e   : > { %3515 = vmatprep.subr.bf16.mxu0 %v3877_v30 }
 0xe6f   : > { %2186 = vadd.xlane.f32.xlu0 %v4750_v33 }
 0xefa   : > { %v2185_v13 = vpop.xlane.xlu1 %2184 }
 0xefb   : > { %v2188_v43 = vmul.f32 0.0078125, %v2185_v13  ;;  %v3886_v13 = vld [vmem:[%s4450_s22 + $0xd0] sm:$0xff]  }
 0xefc   : > { %v2187_v22 = vpop.xlane.xlu0 %2186 }
 0xefd   : > { %v4762_v44 = vsub.f32 %v4747_v31, %v2188_v43  ;;  %v2189_v45 = vmul.f32 0.0078125, %v2187_v22  ;;  %v3887_v43 = vld [vmem:[%s4450_s22 + $0x10] sm:$0xff]  }
 0xefe   : > { %v3888_v22 = vld [vmem:[%s4450_s22 + $0x90] sm:$0xff]  }
 0xeff   : > { %v4765_v46 = vsub.f32 %v4750_v33, %v2189_v45  ;;  %v2192_v47 = vmul.f32 %v4762_v44, %v4762_v44  ;;  %v3890_v45 = vld [vmem:[%s4450_s22 + $0xd8] sm:$0xff]  }
 0xf01   : > { %2194 = vadd.xlane.f32.xlu0 %v2192_v47  ;;  %v2193_v48 = vmul.f32 %v4765_v46, %v4765_v46  ;;  %v3892_v47 = vld [vmem:[%s4450_s22 + $0x98] sm:$0xff]  }
 0xf03   : > { %2196 = vadd.xlane.f32.xlu1 %v2193_v48  ;;  %v3893_v48 = vld [vmem:[%s4450_s22 + $0x60] sm:$0xff]  }
 0xf8e   : > { %v2195_v9 = vpop.xlane.xlu0 %2194 }
 0xf8f   : > { %v2198_v20 = vmul.f32 0.0078125, %v2195_v9 }
 0xf90   : > { %v2197_v11 = vpop.xlane.xlu1 %2196 }
 0xf91   : > { %v2200_v12 = vadd.f32 1e-05, %v2198_v20  ;;  %v2199_v14 = vmul.f32 0.0078125, %v2197_v11 }
 0xf93   : > { %3945 = vrsqrt.f32 %v2200_v12  ;;  %v2201_v15 = vadd.f32 1e-05, %v2199_v14 }
 0xf95   : > { %3947 = vrsqrt.f32 %v2201_v15 }
 0xf9d   : > { %v3946_v16 = vpop.eup %3945 }
 0xf9e   : > { %v2204_v6 = vmul.f32 %v3946_v16, %v4762_v44  ;;  %v3889_v44 = vld [vmem:[%s4450_s22 + $0x58] sm:$0xff]  }
 0xf9f   : > { %v3948_v19 = vpop.eup %3947 }
 0xfa0   : > { %v2205_v23 = vmul.f32 %v3948_v19, %v4765_v46  ;;  %v2212_v24 = vmul.f32 %v3388_v17, %v2204_v6  ;;  %v3891_v46 = vld [vmem:[%s4450_s22 + $0x18] sm:$0xff]   ;;  %s5079_s22 = sld [smem:[#allocation22_spill]] }
 0xfa2   : > { %v2213_v27 = vmul.f32 %v3388_v17, %v2205_v23  ;;  %v2220_v28 = vadd.f32 %v3389_v25, %v2212_v24 }
 0xfa4   : > { %v2221_v29 = vadd.f32 %v3389_v25, %v2213_v27 }
 0xfa6   : > { %v2222_v32 = vpack.c.bf16 %v2221_v29, %v2220_v28 }
 0xfa8   : > { %2470 = vmatmul.mubr.bf16.vlgmr.msra.gmra.mrb[44].mxu0 %v2222_v32  ;;  %2513 = vmatmul.mubr.bf16.vlgmr.msra.gmra.mrb[44].mxu1 %v2222_v32 }
 0xfa9   : > { %3516 = vmatpush3.bf16.msra.mxu0 %v3879_v35  ;;  %3538 = vmatpush3.bf16.msra.mxu1 %v3880_v36 }
 0xfaa   : > { %3517 = vmatprep.subr.bf16.mxu0 %v3881_v37  ;;  %3539 = vmatprep.subr.bf16.mxu1 %v3882_v38 }
 0xfad   : > { %3518 = vmatpush3.bf16.msra.mxu0 %v3883_v39  ;;  %3540 = vmatpush3.bf16.msra.mxu1 %v3884_v10 }
 0xfae   : > { %3519 = vmatprep.subr.bf16.mxu0 %v3885_v41  ;;  %3541 = vmatprep.subr.bf16.mxu1 %v3886_v13 }
 0xfb1   : > { %3520 = vmatpush3.bf16.msra.mxu0 %v3887_v43  ;;  %3542 = vmatpush3.bf16.msra.mxu1 %v3888_v22 }
 0xfb2   : > { %3521 = vmatprep.subr.bf16.mxu0 %v3889_v44  ;;  %3543 = vmatprep.subr.bf16.mxu1 %v3890_v45 }
 0xfb5   : > { %3522 = vmatpush3.bf16.msra.mxu0 %v3891_v46  ;;  %3544 = vmatpush3.bf16.msra.mxu1 %v3892_v47 }
 0xfb6   : > { %3523 = vmatprep.subr.bf16.mxu0 %v3893_v48  ;;  %3545 = vmatprep.subr.bf16.mxu1 %v3894_v49 }
 0xfb9   : > { %3524 = vmatpush3.bf16.msra.mxu0 %v3895_v50  ;;  %3546 = vmatpush3.bf16.msra.mxu1 %v3896_v51 }
 0xfba   : > { %3525 = vmatprep.subr.bf16.mxu0 %v3897_v52  ;;  %3547 = vmatprep.subr.bf16.mxu1 %v3898_v40 }
 0xfbd   : > { %3526 = vmatpush3.bf16.msra.mxu0 %v3899_v53  ;;  %3548 = vmatpush3.bf16.msra.mxu1 %v3900_v54 }
 0xfbe   : > { %3527 = vmatprep.subr.bf16.mxu0 %v3901_v42  ;;  %3549 = vmatprep.subr.bf16.mxu1 %v3902_v55 }
 0xfc1   : > { %3528 = vmatpush3.bf16.msra.mxu0 %v3903_v26  ;;  %3550 = vmatpush3.bf16.msra.mxu1 %v3904_v58 }
 0xfc2   : > { %3529 = vmatprep.subr.bf16.mxu0 %v3905_v60  ;;  %3551 = vmatprep.subr.bf16.mxu1 %v3906_v21 }
 0xfc5   : > { %3530 = vmatpush3.bf16.msra.mxu0 %v3907_v62  ;;  %3552 = vmatpush3.bf16.msra.mxu1 %v3908_v63 }
0x107b   : > { %v2471_v7 = vpop.f32.mrb[44].mxu0  ;;  %v2514_v4 = vpop.f32.mrb[44].mxu1 }
0x107c   : > { %v2472_v8 = vadd.f32 %v2471_v7, %v2260_v18  ;;  %v2515_v9 = vadd.f32 %v2514_v4, %v2268_v2  ;;  %v2473_v20 = vpop.f32.mrb[45].mxu0  ;;  %v2516_v11 = vpop.f32.mrb[45].mxu1 }
0x107d   : > { %v4847_v12 = vadd.f32 %v2473_v20, %v2264_v3  ;;  %v4849_v14 = vadd.f32 %v2516_v11, %v2272_v5  ;;  %v2475_v15 = vpop.f32.mrb[46].mxu0  ;;  %v2518_v16 = vpop.f32.mrb[46].mxu1 }
0x107e   : > { %v4851_v61 = vmul.f32 0.70710677, %v2472_v8  ;;  %v4853_v17 = vmul.f32 0.70710677, %v2515_v9  ;;  %v2477_v23 = vpop.f32.mrb[47].mxu0  ;;  %v2520_v28 = vpop.f32.mrb[47].mxu1  ;;  %v4865_v35 = vadd.f32 %v2475_v15, %v2260_v18  ;;  %v4870_v38 = vadd.f32 %v2518_v16, %v2268_v2 }
0x107f   : > { %v4856_v56 = vmul.f32 0.70710677, %v4847_v12  ;;  %v4862_v19 = vmul.f32 0.70710677, %v4849_v14  ;;  %v4872_v10 = vadd.f32 %v2477_v23, %v2264_v3  ;;  %v4882_v49 = vadd.f32 %v2520_v28, %v2272_v5 }
0x1080   : > { %v2555_v57 = vand.u32 2147483647, %v4851_v61  ;;  %v2557_v59 = vand.u32 2147483647, %v4853_v17  ;;  %v4868_v37 = vmul.f32 0.70710677, %v4865_v35 }
0x1081   : > { %v2556_v6 = vand.u32 2147483647, %v4856_v56  ;;  %v2558_v30 = vand.u32 2147483647, %v4862_v19  ;;  %v4876_v43 = vmul.f32 0.70710677, %v4870_v38 }
0x1082   : > { %v2563_v24 = vmul.f32 0.3275911, %v2555_v57  ;;  %v2565_v25 = vmul.f32 0.3275911, %v2557_v59  ;;  %v2559_v41 = vand.u32 2147483647, %v4868_v37 }
0x1083   : > { %v2564_v27 = vmul.f32 0.3275911, %v2556_v6  ;;  %v2566_v36 = vmul.f32 0.3275911, %v2558_v30  ;;  %v2667_v13 = vsub.f32 0.0, %v2555_v57  ;;  %v2669_v22 = vsub.f32 0.0, %v2557_v59 }
0x1084   : > { %v2571_v29 = vadd.f32 1.0, %v2563_v24  ;;  %v2573_v32 = vadd.f32 1.0, %v2565_v25  ;;  %v2567_v44 = vmul.f32 0.3275911, %v2559_v41  ;;  %v2668_v45 = vsub.f32 0.0, %v2556_v6 }
0x1085   : > { %v2572_v34 = vadd.f32 1.0, %v2564_v27  ;;  %v2574_v39 = vadd.f32 1.0, %v2566_v36  ;;  %v2561_v46 = vand.u32 2147483647, %v4876_v43  ;;  %v4880_v47 = vmul.f32 0.70710677, %v4872_v10 }
0x1086   : > { %3949 = vrcp.f32 %v2571_v29  ;;  %v2575_v48 = vadd.f32 1.0, %v2567_v44  ;;  %v2675_v50 = vmul.f32 %v2667_v13, %v2555_v57  ;;  %v2677_v53 = vmul.f32 %v2669_v22, %v2557_v59 }
0x1087   : > { %3951 = vrcp.f32 %v2573_v32  ;;  %v2569_v51 = vmul.f32 0.3275911, %v2561_v46  ;;  %v4885_v52 = vand.u32 2147483647, %v4880_v47  ;;  %v2670_v54 = vsub.f32 0.0, %v2558_v30 }
0x1088   : > { %3953 = vrcp.f32 %v2572_v34  ;;  %v2676_v26 = vmul.f32 %v2668_v45, %v2556_v6  ;;  %v4893_v21 = vmul.f32 0.5, %v2472_v8  ;;  %v4895_v62 = vmul.f32 0.5, %v2515_v9 }
0x1089   : > { %3955 = vrcp.f32 %v2574_v39  ;;  %v2577_v58 = vadd.f32 1.0, %v2569_v51  ;;  %v2568_v60 = vmul.f32 0.3275911, %v4885_v52  ;;  %v4899_v0 = vmul.f32 0.70710677, %v4882_v49 }
0x108a   : > { %3957 = vrcp.f32 %v2575_v48  ;;  %v2683_v18 = vmul.f32 1.442695, %v2675_v50  ;;  %v2687_v7 = vmul.f32 1.442695, %v2677_v53  ;;  %v2678_v4 = vmul.f32 %v2670_v54, %v2558_v30 }
0x108b   : > { %3959 = vrcp.f32 %v2577_v58  ;;  %v2576_v2 = vadd.f32 1.0, %v2568_v60  ;;  %v4904_v20 = vand.u32 2147483647, %v4899_v0  ;;  %v2685_v11 = vmul.f32 1.442695, %v2676_v26 }
0x108c   : > { %v2671_v15 = vsub.f32 0.0, %v2559_v41  ;;  %v2673_v59 = vsub.f32 0.0, %v2561_v46  ;;  %v2689_v28 = vmul.f32 1.442695, %v2678_v4  ;;  %vm2539_vm5 = vcmp.ge.f32.partialorder %v4851_v61, 0.0 }
0x108d   : > { %3961 = vrcp.f32 %v2576_v2  ;;  %v2570_v6 = vmul.f32 0.3275911, %v4904_v20  ;;  %v2672_v53 = vsub.f32 0.0, %v4885_v52  ;;  %vm2541_vm6 = vcmp.ge.f32.partialorder %v4853_v17, 0.0 }
0x108e   : > { %3963 = vpow2.f32 %v2683_v18  ;;  %v2679_v13 = vmul.f32 %v2671_v15, %v2559_v41  ;;  %v2681_v22 = vmul.f32 %v2673_v59, %v2561_v46  ;;  %v2674_v15 = vsub.f32 0.0, %v4904_v20 }
0x108f   : > { %3965 = vpow2.f32 %v2687_v7  ;;  %v2578_v29 = vadd.f32 1.0, %v2570_v6  ;;  %vm2540_vm7 = vcmp.ge.f32.partialorder %v4856_v56, 0.0  ;;  %vm2543_vm8 = vcmp.ge.f32.partialorder %v4868_v37, 0.0 }
0x1090   : > { %v4887_v40 = vpop.eup %3949  ;;  %3967 = vpow2.f32 %v2685_v11  ;;  %v2691_v60 = vmul.f32 1.442695, %v2679_v13  ;;  %v2680_v11 = vmul.f32 %v2672_v53, %v4885_v52  ;;  %vm2545_vm9 = vcmp.ge.f32.partialorder %v4876_v43, 0.0 }
0x1091   : > { %v4889_v42 = vpop.eup %3951  ;;  %v2595_v55 = vmul.f32 1.0614054, %v4887_v40  ;;  %3969 = vrcp.f32 %v2578_v29  ;;  %vm2542_vm10 = vcmp.ge.f32.partialorder %v4862_v19, 0.0  ;;  %vm2544_vm11 = vcmp.ge.f32.partialorder %v4880_v47, 0.0 }
0x1092   : > { %v2597_v63 = vmul.f32 1.0614054, %v4889_v42  ;;  %v4901_v3 = vpop.eup %3953  ;;  %3971 = vpow2.f32 %v2689_v28  ;;  %vm2546_vm12 = vcmp.ge.f32.partialorder %v4899_v0, 0.0  ;;  %v2526_v0 = vmul.f32 0.5, %v4849_v14 }
0x1093   : > { %v2603_v1 = vadd.f32 -1.4531521, %v2595_v55  ;;  %v2596_v9 = vmul.f32 1.0614054, %v4901_v3  ;;  %v4908_v16 = vpop.eup %3955  ;;  %3973 = vpow2.f32 %v2691_v60 }
0x1094   : > { %v2605_v5 = vadd.f32 -1.4531521, %v2597_v63  ;;  %v2598_v25 = vmul.f32 1.0614054, %v4908_v16  ;;  %v4915_v36 = vpop.eup %3957 }
0x1095   : > { %v2611_v8 = vmul.f32 %v4887_v40, %v2603_v1  ;;  %v2604_v24 = vadd.f32 -1.4531521, %v2596_v9  ;;  %v2599_v50 = vmul.f32 1.0614054, %v4915_v36  ;;  %v4922_v54 = vpop.eup %3959  ;;  %v2695_v1 = vmul.f32 1.442695, %v2681_v22 }
0x1096   : > { %v2613_v57 = vmul.f32 %v4889_v42, %v2605_v5  ;;  %v2606_v34 = vadd.f32 -1.4531521, %v2598_v25  ;;  %v2601_v63 = vmul.f32 1.0614054, %v4922_v54 }
0x1097   : > { %v2619_v23 = vadd.f32 1.4214138, %v2611_v8  ;;  %v2612_v30 = vmul.f32 %v4901_v3, %v2604_v24  ;;  %v2607_v26 = vadd.f32 -1.4531521, %v2599_v50  ;;  %v4930_v4 = vpop.eup %3961  ;;  %3975 = vpow2.f32 %v2695_v1 }
0x1098   : > { %v2621_v27 = vadd.f32 1.4214138, %v2613_v57  ;;  %v2614_v48 = vmul.f32 %v4908_v16, %v2606_v34  ;;  %v2609_v9 = vadd.f32 -1.4531521, %v2601_v63  ;;  %v3964_v57 = vpop.eup %3963  ;;  %v2600_v28 = vmul.f32 1.0614054, %v4930_v4 }
0x1099   : > { %v2627_v32 = vmul.f32 %v4887_v40, %v2619_v23  ;;  %v2620_v45 = vadd.f32 1.4214138, %v2612_v30  ;;  %v2615_v7 = vmul.f32 %v4915_v36, %v2607_v26  ;;  %v3966_v25 = vpop.eup %3965  ;;  %v2693_v50 = vmul.f32 1.442695, %v2680_v11 }
0x109a   : > { %v2629_v39 = vmul.f32 %v4889_v42, %v2621_v27  ;;  %v2622_v46 = vadd.f32 1.4214138, %v2614_v48  ;;  %v2617_v27 = vmul.f32 %v4922_v54, %v2609_v9  ;;  %v3968_v29 = vpop.eup %3967 }
0x109b   : > { %v2635_v44 = vadd.f32 -0.28449672, %v2627_v32  ;;  %v2628_v41 = vmul.f32 %v4901_v3, %v2620_v45  ;;  %v2623_v24 = vadd.f32 1.4214138, %v2615_v7  ;;  %v4942_v34 = vpop.eup %3969  ;;  %3977 = vpow2.f32 %v2693_v50 }
0x109c   : > { %v2637_v51 = vadd.f32 -0.28449672, %v2629_v39  ;;  %v2630_v5 = vmul.f32 %v4908_v16, %v2622_v46  ;;  %v4144_v39 = vmov -1.0   ;;  %v2625_v22 = vadd.f32 1.4214138, %v2617_v27 }
0x109d   : > { %v2643_v55 = vmul.f32 %v4887_v40, %v2635_v44  ;;  %v2636_v2 = vadd.f32 -0.28449672, %v2628_v41  ;;  %v2547_v13 = vsel %vm2539_vm5, 1.0, %v4144_v39  ;;  %v2608_v44 = vadd.f32 -1.4531521, %v2600_v28 }
0x109e   : > { %v2645_v58 = vmul.f32 %v4889_v42, %v2637_v51  ;;  %v2638_v23 = vadd.f32 -0.28449672, %v2630_v5  ;;  %v3972_v51 = vpop.eup %3971  ;;  %v2549_v53 = vsel %vm2541_vm6, 1.0, %v4144_v39  ;;  %v2602_v61 = vmul.f32 1.0614054, %v4942_v34 }
0x109f   : > { %v2651_v18 = vadd.f32 0.2548296, %v2643_v55  ;;  %v2644_v6 = vmul.f32 %v4901_v3, %v2636_v2  ;;  %v2633_v55 = vmul.f32 %v4922_v54, %v2625_v22  ;;  %v2616_v41 = vmul.f32 %v4930_v4, %v2608_v44 }
0x10a0   : > { %v2653_v8 = vadd.f32 0.2548296, %v2645_v58  ;;  %v2646_v30 = vmul.f32 %v4908_v16, %v2638_v23  ;;  %v2548_v56 = vsel %vm2540_vm7, 1.0, %v4144_v39  ;;  %v2551_v28 = vsel %vm2543_vm8, 1.0, %v4144_v39 }
0x10a1   : > { %v2659_v59 = vmul.f32 %v4887_v40, %v2651_v18  ;;  %v2652_v32 = vadd.f32 0.2548296, %v2644_v6  ;;  %v2631_v40 = vmul.f32 %v4915_v36, %v2623_v24  ;;  %v2641_v63 = vadd.f32 -0.28449672, %v2633_v55 }
0x10a2   : > { %v2661_v52 = vmul.f32 %v4889_v42, %v2653_v8  ;;  %v2682_v42 = vmul.f32 %v2674_v15, %v4904_v20  ;;  %v2654_v58 = vadd.f32 0.2548296, %v2646_v30  ;;  %v2624_v1 = vadd.f32 1.4214138, %v2616_v41  ;;  %v3974_v15 = vpop.eup %3973 }
0x10a3   : > { %v2699_v45 = vmul.f32 %v3964_v57, %v2659_v59  ;;  %v2639_v48 = vadd.f32 -0.28449672, %v2631_v40  ;;  %v2660_v26 = vmul.f32 %v4901_v3, %v2652_v32  ;;  %v2610_v20 = vadd.f32 -1.4531521, %v2602_v61  ;;  %v3976_v27 = vpop.eup %3975 }
0x10a4   : > { %v2701_v46 = vmul.f32 %v3966_v25, %v2661_v52  ;;  %v2697_v17 = vmul.f32 1.442695, %v2682_v42  ;;  %v2649_v5 = vmul.f32 %v4922_v54, %v2641_v63  ;;  %v2632_v7 = vmul.f32 %v4930_v4, %v2624_v1 }
0x10a5   : > { %v2647_v60 = vmul.f32 %v4915_v36, %v2639_v48  ;;  %v2707_v18 = vsub.f32 1.0, %v2699_v45  ;;  %v2618_v8 = vmul.f32 %v4942_v34, %v2610_v20  ;;  %v2700_v3 = vmul.f32 %v3968_v29, %v2660_v26  ;;  %v3978_v55 = vpop.eup %3977 }
0x10a6   : > { %v2709_v9 = vsub.f32 1.0, %v2701_v46  ;;  %v2662_v57 = vmul.f32 %v4908_v16, %v2654_v58  ;;  %v2657_v59 = vadd.f32 0.2548296, %v2649_v5  ;;  %v2640_v6 = vadd.f32 -0.28449672, %v2632_v7 }
0x10a7   : > { %v2655_v2 = vadd.f32 0.2548296, %v2647_v60  ;;  %v2626_v23 = vadd.f32 1.4214138, %v2618_v8  ;;  %v2715_v24 = vmul.f32 %v2707_v18, %v2547_v13  ;;  %3979 = vpow2.f32 %v2697_v17 }
0x10a8   : > { %v2665_v29 = vmul.f32 %v4922_v54, %v2657_v59  ;;  %v2648_v37 = vmul.f32 %v4930_v4, %v2640_v6  ;;  %v2717_v52 = vmul.f32 %v2709_v9, %v2549_v53  ;;  %v2708_v32 = vsub.f32 1.0, %v2700_v3 }
0x10a9   : > { %v2663_v11 = vmul.f32 %v4915_v36, %v2655_v2  ;;  %v2634_v36 = vmul.f32 %v4942_v34, %v2626_v23  ;;  %v2702_v30 = vmul.f32 %v3972_v51, %v2662_v57  ;;  %v2723_v44 = vadd.f32 1.0, %v2715_v24 }
0x10aa   : > { %v2705_v40 = vmul.f32 %v3976_v27, %v2665_v29  ;;  %v2656_v13 = vadd.f32 0.2548296, %v2648_v37  ;;  %v2527_v45 = vmul.f32 0.5, %v4865_v35  ;;  %v2553_v54 = vsel %vm2545_vm9, 1.0, %v4144_v39 }
0x10ab   : > { %v2703_v25 = vmul.f32 %v3974_v15, %v2663_v11  ;;  %v2642_v22 = vadd.f32 -0.28449672, %v2634_v36  ;;  %v2725_v41 = vadd.f32 1.0, %v2717_v52  ;;  %v2716_v43 = vmul.f32 %v2708_v32, %v2548_v56 }
0x10ac   : > { %v2713_v50 = vsub.f32 1.0, %v2705_v40  ;;  %v2664_v42 = vmul.f32 %v4930_v4, %v2656_v13  ;;  %v2710_v61 = vsub.f32 1.0, %v2702_v30  ;;  %v2731_v35 = vmul.f32 %v2723_v44, %v4893_v21 }
0x10ad   : > { %v2711_v16 = vsub.f32 1.0, %v2703_v25  ;;  %v2650_v53 = vmul.f32 %v4942_v34, %v2642_v22  ;;  %v2550_v60 = vsel %vm2542_vm10, 1.0, %v4144_v39  ;;  %v2529_v4 = vmul.f32 0.5, %v4870_v38 }
0x10ae   : > { %v2721_v46 = vmul.f32 %v2713_v50, %v2553_v54  ;;  %v2704_v26 = vmul.f32 %v3978_v55, %v2664_v42  ;;  %v2552_v20 = vsel %vm2544_vm11, 1.0, %v4144_v39  ;;  %v2733_v17 = vmul.f32 %v2725_v41, %v4895_v62 }
0x10af   : > { %v2719_v48 = vmul.f32 %v2711_v16, %v2551_v28  ;;  %v2658_v58 = vadd.f32 0.2548296, %v2650_v53  ;;  %v2724_v5 = vadd.f32 1.0, %v2716_v43  ;;  %v2718_v21 = vmul.f32 %v2710_v61, %v2550_v60 }
0x10b0   : > { %v2729_v1 = vadd.f32 1.0, %v2721_v46  ;;  %v2712_v18 = vsub.f32 1.0, %v2704_v26  ;;  %v2524_v3 = vmul.f32 0.5, %v4847_v12  ;;  %v2528_v11 = vmul.f32 0.5, %v4872_v10 }
0x10b1   : > { %v2727_v51 = vadd.f32 1.0, %v2719_v48  ;;  %v2666_v2 = vmul.f32 %v4942_v34, %v2658_v58  ;;  %v3980_v47 = vpop.eup %3979  ;;  %v2554_v34 = vsel %vm2546_vm12, 1.0, %v4144_v39  ;;  %v2726_v62 = vadd.f32 1.0, %v2718_v21  ;;  %v3422_v39 = vld [vmem:[%s704_s19] ss:$0 sm:$0xff] }
0x10b2   : > { %v2737_v8 = vmul.f32 %v2729_v1, %v2529_v4  ;;  %v2720_v19 = vmul.f32 %v2712_v18, %v2552_v20  ;;  %v2732_v59 = vmul.f32 %v2724_v5, %v2524_v3  ;;  %v2530_v24 = vmul.f32 0.5, %v4882_v49 }
0x10b3   : > { %v2735_v63 = vmul.f32 %v2727_v51, %v2527_v45  ;;  %v2706_v9 = vmul.f32 %v3980_v47, %v2666_v2  ;;  %v2734_v27 = vmul.f32 %v2726_v62, %v2526_v0 }
0x10b4   : > { %v2741_v38 = vpack.c.bf16 %v2737_v8, %v2733_v17  ;;  %v2728_v15 = vadd.f32 1.0, %v2720_v19 }
0x10b5   : > { %v2739_v7 = vpack.c.bf16 %v2735_v63, %v2731_v35  ;;  %v2714_v57 = vsub.f32 1.0, %v2706_v9 }
0x10b6   : > { %v2736_v6 = vmul.f32 %v2728_v15, %v2528_v11 }
0x10b7   : > { %v2722_v23 = vmul.f32 %v2714_v57, %v2554_v34 }
0x10b8   : > { %v2740_v25 = vpack.c.bf16 %v2736_v6, %v2732_v59 }
0x10b9   : > { %v2730_v56 = vadd.f32 1.0, %v2722_v23 }
0x10ba   : > { %3038 = vmatprep.mubr.bf16.mxu0 %v2740_v25 }
0x10bb   : > { %v2738_v12 = vmul.f32 %v2730_v56, %v2530_v24  ;;  %3039 = vmatmul.mubr.bf16.vlgmr.msra.gmra.mrb[48].mxu0 %v2739_v7 }
0x10bd   : > { %v2742_v10 = vpack.c.bf16 %v2738_v12, %v2734_v27 }
0x10bf   : > { %3079 = vmatprep.mubr.bf16.mxu1 %v2742_v10 }
0x10c0   : > { %3080 = vmatmul.mubr.bf16.vlgmr.msra.gmra.mrb[48].mxu1 %v2741_v38 }
0x118e   : > { %v3531_v28 = vpop.f32.mrb[48].mxu0 }
0x118f   : > { %v3532_v29 = vpop.f32.mrb[49].mxu0 }
0x1190   : > { %v3533_v37 = vadd.f32 %v3532_v29, %v3531_v28  ;;  %v3534_v14 = vpop.f32.mrb[50].mxu0 }
0x1191   : > { %v3535_v36 = vpop.f32.mrb[51].mxu0 }
0x1192   : > { %v3041_v52 = vadd.f32 %v3533_v37, %v3422_v39  ;;  %v3536_v32 = vadd.f32 %v3535_v36, %v3534_v14 }
0x1193   : > { %v3553_v49 = vpop.f32.mrb[48].mxu1 }
0x1194   : > { %v3554_v16 = vpop.f32.mrb[49].mxu1  ;;  %v3044_v13 = vadd.f32 %v3536_v32, %v3422_v39 }
0x1195   : > { %v3555_v30 = vadd.f32 %v3554_v16, %v3553_v49  ;;  %v3556_v40 = vpop.f32.mrb[50].mxu1 }
0x1196   : > { %v3557_v22 = vpop.f32.mrb[51].mxu1 }
0x1197   : > { %v3082_v44 = vadd.f32 %v3555_v30, %v3041_v52  ;;  %v3558_v45 = vadd.f32 %v3557_v22, %v3556_v40 }
0x1199   : > { %v3088_v48 = vadd.f32 %v3082_v44, %v4747_v31  ;;  %v3085_v54 = vadd.f32 %v3558_v45, %v3044_v13 }
0x119b   : > { %3090 = vst [vmem:[#allocation2] sm:$0xff] %v3088_v48  ;;  %3092 = vst [vmem:[%s5079_s22] sm:$0xff] %v3088_v48  ;;  %v3089_v50 = vadd.f32 %v3085_v54, %v4750_v33 }
0x119d   : > { %3091 = vst [vmem:[#allocation2 + $0x8] sm:$0xff] %v3089_v50  ;;  %3093 = vst [vmem:[%s5079_s22 + $0x8] sm:$0xff] %v3089_v50 }
0x119e PF: > { %s29_s30 = sadd.s32 1, %s4127_s30   ;;  %s5080_s25 = sld [smem:[#allocation10_spill]] }
0x119f   : > { %p26_p7 = scmp.ge.s32.totalorder %s29_s30, 4   ;;  %s5081_s26 = sld [smem:[#allocation11_spill]] }
0x11a0   : > { %s5082_s27 = sld [smem:[#allocation14_spill]]  ;;  %s5083_s28 = sld [smem:[#allocation12_spill]] }
0x11a1   : > { %s5084_s29 = sld [smem:[#allocation13_spill]]  ;;  %28 = sbr.rel (!%p26_p7) target bundleno = 15 (0xf), region = 170 }
0x11a8   :  { %3116 = vsyncpa [#allocation4], 1 }
0x11a9   :  { %3118 = vsyncpa [#allocation4 + $0x1], 1 }
0x11aa   :  { %3119 = vsyncpa [#allocation6], 1 }
0x11ab   :  { %3121 = vsyncpa [#allocation6 + $0x1], 1 }

</bundles_post_ra>
